<compile_context>
chip_gen: v5e
topology: v5e:2x2
jax: 0.10.0
libtpu: 0.0.40
codegen_flags: <defaults>
</compile_context>

<pallas_src>
import numpy as np
import jax
import jax.numpy as jnp
from jax.experimental import pallas as pl
from jax.experimental.pallas import tpu as pltpu


def _round_up(x, m):
    return ((x + m - 1) // m) * m


def _vmem_capacity_bytes(default=64 * 1024 * 1024):
    """Physical VMEM per TensorCore; fallback is v7x's 64 MiB (safe everywhere)."""
    try:
        info = pltpu.get_tpu_info()
        cap = getattr(info, "vmem_capacity_bytes", None)
        if cap:
            return int(cap)
    except Exception:
        pass
    return default


def _pose_kernel(scale_ref, phase_ref, x_ref, o_ref):
    # scale_ref/phase_ref: (2F, 1) f32 ; x_ref: (tr, tn) ; o_ref: (tr, 2F, tn)
    x = x_ref[...].astype(jnp.float32)                    # (tr, tn)
    scale = scale_ref[...]                                # (2F, 1)
    phase = phase_ref[...]                                # (2F, 1)
    # (tr, 1, tn) * (1, 2F, 1) + (1, 2F, 1) -> (tr, 2F, tn); cos == sin(x+pi/2)
    arg = x[:, None, :] * scale[None, :, :] + phase[None, :, :]
    o_ref[...] = jnp.sin(arg).astype(o_ref.dtype)


def pose_initial_forward(xyz, out_dim, alpha, beta, *, out_dtype=None,
                         max_lane_tile=4096):
    """xyz: (B, in_dim, N). Returns (B, out_dim, N) sinusoidal embedding."""
    B, in_dim, N = xyz.shape
    assert out_dim % (in_dim * 2) == 0, "out_dim must be divisible by 2*in_dim"
    feat_dim = out_dim // (in_dim * 2)
    two_f = 2 * feat_dim
    R = B * in_dim

    out_dtype = jnp.dtype(out_dtype) if out_dtype is not None else jnp.dtype(xyz.dtype)
    in_item = jnp.dtype(xyz.dtype).itemsize
    out_item = out_dtype.itemsize

    x2d = xyz.reshape(R, N)

    # Per-output-channel scale & phase, precomputed on host in float64.
    j = np.arange(two_f)
    scale_np = (float(beta) / np.power(float(alpha), (j // 2) / float(feat_dim))
                ).astype(np.float32)
    phase_np = np.where(j % 2 == 1, np.pi / 2.0, 0.0).astype(np.float32)
    scale = jnp.asarray(scale_np).reshape(two_f, 1)
    phase = jnp.asarray(phase_np).reshape(two_f, 1)

    # ---- generation-aware VMEM policy --------------------------------------
    vmem_cap = _vmem_capacity_bytes()                       # 128 MiB v5e/v6e, 64 MiB v7x
    vmem_limit = min((vmem_cap * 3) // 4, 96 * 1024 * 1024) # 96 MiB (v5e/v6e) / 48 MiB (v7x)
    budget = vmem_limit // 2                                # live double-buffered blocks

    # Real per-block footprint: the 2F axis sits on sublanes and pads to a
    # multiple of 8 (f32) / 16 (bf16); the f32 `arg` intermediate is counted too.
    pad2f_out = _round_up(two_f, 8 * max(1, 4 // out_item))
    pad2f_f32 = _round_up(two_f, 8)
    # bytes per (row, lane) element: 2x input buf + 2x output buf + f32 arg
    per_rl = 2 * in_item + 2 * pad2f_out * out_item + pad2f_f32 * 4

    # ---- lane tile: multiple of 128 (full extent only if N < 128) ----------
    tr_min = min(R, 8)
    tn_cap = max(128, budget // max(1, tr_min * per_rl))
    if N < 128:
        tn = N                                    # full extent -> legal block dim
    else:
        tn = min(tn_cap, max_lane_tile, (N // 128) * 128)
        tn = max(128, (tn // 128) * 128)

    # ---- row tile: full extent if it fits, else multiple of 8 + cdiv grid ---
    tr_cap = max(1, budget // max(1, tn * per_rl))
    if tr_cap >= R or R <= 8:
        tr = R
    else:
        tr = max(8, (tr_cap // 8) * 8)

    # Keep >= 2 grid steps when possible so v7x can shard the ("parallel",
    # "parallel") grid across its 2 TensorCores.
    if pl.cdiv(R, tr) == 1 and pl.cdiv(N, tn) == 1 and tn >= 256:
        tn = max(128, ((tn // 2) // 128) * 128)

    grid = (pl.cdiv(R, tr), pl.cdiv(N, tn))       # ragged final blocks are masked

    out_elems = R * two_f * N
    cost = pl.CostEstimate(
        flops=2 * out_elems,
        transcendentals=out_elems,
        bytes_accessed=R * N * in_item + out_elems * out_item + 2 * two_f * 4,
    )

    out3d = pl.pallas_call(
        _pose_kernel,
        out_shape=jax.ShapeDtypeStruct((R, two_f, N), out_dtype),
        grid_spec=pltpu.PrefetchScalarGridSpec(
            num_scalar_prefetch=0,
            grid=grid,
            in_specs=[
                pl.BlockSpec((two_f, 1), lambda i, j: (0, 0)),   # scale (constant block)
                pl.BlockSpec((two_f, 1), lambda i, j: (0, 0)),   # phase (constant block)
                pl.BlockSpec((tr, tn), lambda i, j: (i, j)),     # xyz rows
            ],
            out_specs=pl.BlockSpec((tr, two_f, tn), lambda i, j: (i, 0, j)),
        ),
        compiler_params=pltpu.CompilerParams(
            dimension_semantics=("parallel", "parallel"),
            vmem_limit_bytes=int(vmem_limit),
        ),
        cost_estimate=cost,
    )(scale, phase, x2d)

    # Pure metadata reshape: (B*in_dim, 2F, N) -> (B, out_dim, N), identical to
    # PyTorch's permute(0,1,3,2).reshape(B, out_dim, N).
    return out3d.reshape(B, out_dim, N)


def _reference(xyz, out_dim, alpha, beta):
    """Pure-JAX mirror of the PyTorch forward."""
    B, in_dim, N = xyz.shape
    feat_dim = out_dim // (in_dim * 2)
    feat_range = jnp.arange(feat_dim, dtype=jnp.float32)
    dim_embed = jnp.power(alpha, feat_range / feat_dim)
    div_embed = (beta * xyz.astype(jnp.float32))[..., None] / dim_embed   # (B,C,N,F)
    sin_embed = jnp.sin(div_embed)
    cos_embed = jnp.cos(div_embed)
    pe = jnp.stack([sin_embed, cos_embed], axis=4)                        # (B,C,N,F,2)
    pe = pe.reshape(B, in_dim, N, 2 * feat_dim)                           # interleave
    return jnp.transpose(pe, (0, 1, 3, 2)).reshape(B, out_dim, N)


if __name__ == "__main__":
    key = jax.random.PRNGKey(0)
    alpha, beta = 100.0, 10.0          # Point-NN style constructor params

    cases = [
        (2, 3, 128, 36),               # lane-aligned N
        (2, 3, 200, 36),               # ragged N -> masked final lane block
    ]
    for (B, in_dim, N, out_dim) in cases:
        key, sub = jax.random.split(key)
        xyz = jax.random.uniform(sub, (B, in_dim, N), dtype=jnp.float32,
                                 minval=-1.0, maxval=1.0)
        out = jax.block_until_ready(pose_initial_forward(xyz, out_dim, alpha, beta))
        ref = _reference(xyz, out_dim, alpha, beta)

        assert out.shape == ref.shape == (B, out_dim, N)
        # cos = sin(x + pi/2) and host-precomputed scales differ from the
        # reference only at the ~1e-6 level for these argument magnitudes.
        assert jnp.allclose(out, ref, atol=1e-4, rtol=1e-4), \
            float(jnp.max(jnp.abs(out - ref)))

    print("KERNEL_OK")
</pallas_src>

<mosaic_0001>
module attributes {stable_mosaic.version = 11 : i64} {
  func.func @_pose_kernel(%arg0: i32, %arg1: i32, %arg2: memref<12x1xf32, #tpu.memory_space<vmem>>, %arg3: memref<12x1xf32, #tpu.memory_space<vmem>>, %arg4: memref<6x128xf32, #tpu.memory_space<vmem>>, %arg5: memref<6x12x128xf32, #tpu.memory_space<vmem>>) attributes {dimension_semantics = [#tpu.dimension_semantics<parallel>, #tpu.dimension_semantics<parallel>], iteration_bounds = array<i64: 1, 1>, scalar_prefetch = 0 : i64, scratch_operands = 0 : i64, tpu.core_type = #tpu.core_type<tc>, window_params = [{pipeline_mode = #tpu.pipeline_mode<synchronous>, transform_indices = @transform_0, window_bounds = array<i64: 12, 1>}, {pipeline_mode = #tpu.pipeline_mode<synchronous>, transform_indices = @transform_1, window_bounds = array<i64: 12, 1>}, {transform_indices = @transform_2, window_bounds = array<i64: 6, 128>}, {transform_indices = @transform_3, window_bounds = array<i64: 6, 12, 128>}]} {
    %c0 = arith.constant 0 : index
    %c0_0 = arith.constant 0 : index
    %0 = vector.load %arg4[%c0, %c0_0] : memref<6x128xf32, #tpu.memory_space<vmem>>, vector<6x128xf32>
    %c0_1 = arith.constant 0 : index
    %c0_2 = arith.constant 0 : index
    %1 = vector.load %arg2[%c0_1, %c0_2] : memref<12x1xf32, #tpu.memory_space<vmem>>, vector<12x1xf32>
    %c0_3 = arith.constant 0 : index
    %c0_4 = arith.constant 0 : index
    %2 = vector.load %arg3[%c0_3, %c0_4] : memref<12x1xf32, #tpu.memory_space<vmem>>, vector<12x1xf32>
    %3 = vector.shape_cast %0 : vector<6x128xf32> to vector<6x1x128xf32>
    %4 = vector.shape_cast %1 : vector<12x1xf32> to vector<1x12x1xf32>
    %5 = vector.broadcast %3 : vector<6x1x128xf32> to vector<6x12x128xf32>
    %6 = vector.broadcast %4 : vector<1x12x1xf32> to vector<6x12x128xf32>
    %7 = arith.mulf %5, %6 : vector<6x12x128xf32>
    %8 = vector.shape_cast %2 : vector<12x1xf32> to vector<1x12x1xf32>
    %9 = vector.broadcast %8 : vector<1x12x1xf32> to vector<6x12x128xf32>
    %10 = arith.addf %7, %9 : vector<6x12x128xf32>
    %11 = math.sin %10 : vector<6x12x128xf32>
    %c0_5 = arith.constant 0 : index
    %c0_6 = arith.constant 0 : index
    %c0_7 = arith.constant 0 : index
    %12 = vector.load %arg5[%c0_5, %c0_6, %c0_7] : memref<6x12x128xf32, #tpu.memory_space<vmem>>, vector<6x12x128xf32>
    tpu.vector_store %arg5[%c0_5, %c0_6, %c0_7], %11 {strides = array<i32>} : memref<6x12x128xf32, #tpu.memory_space<vmem>>, vector<6x12x128xf32>,
    return
  }
  func.func @transform_0(%arg0: i32, %arg1: i32) -> (i32, i32) {
    %c0_i32 = arith.constant 0 : i32
    %c0_i32_0 = arith.constant 0 : i32
    %c0_i32_1 = arith.constant 0 : i32
    return %c0_i32, %c0_i32_0 : i32, i32
  }
  func.func @transform_1(%arg0: i32, %arg1: i32) -> (i32, i32) {
    %c0_i32 = arith.constant 0 : i32
    %c0_i32_0 = arith.constant 0 : i32
    %c0_i32_1 = arith.constant 0 : i32
    return %c0_i32, %c0_i32_0 : i32, i32
  }
  func.func @transform_2(%arg0: i32, %arg1: i32) -> (i32, i32) {
    %c0_i32 = arith.constant 0 : i32
    return %arg0, %arg1 : i32, i32
  }
  func.func @transform_3(%arg0: i32, %arg1: i32) -> (i32, i32, i32) {
    %c0_i32 = arith.constant 0 : i32
    %c0_i32_0 = arith.constant 0 : i32
    return %arg0, %c0_i32, %arg1 : i32, i32, i32
  }
}

</mosaic_0001>

<bundles_post_ra>
// kernel: tpu_custom_call.1
= control target key start
LH: loop header
LB: loop body
LE: loop exit
PB: predicated region body
PF: predicated region fallthrough
CT: control target
= control target key end

     0   :  { %v2046_v2 = vmov 0   ;;  %s3361_s0 = inlined_call_operand.vmem [shape: f32[12,1], index: 0, kind: input, shape index: {}]   ;;  %s3362_s1 = inlined_call_operand.vmem [shape: f32[12,1], index: 1, kind: input, shape index: {}]   ;;  %s3363_s2 = inlined_call_operand.vmem [shape: f32[6,128], index: 2, kind: input, shape index: {}]   ;;  %s3364_s3 = inlined_call_operand.hbm [shape: f32[6,12,128], index: 3, kind: output, shape index: {}]  }
   0x1   :  { %v18_v0 = vld [vmem:[%s3362_s1] sm:$0xff]  ;;  %2019 = vset.pattern.permute.xlu1 %v2046_v2  ;;  %2018 = vset.pattern.permute.xlu0 %v2046_v2 }
   0x2   :  { %v16_v1 = vld [vmem:[%s3361_s0] sm:$0xff] }
   0x3   :  { %8 = vsyncpa [#allocation3], 0  ;;  %62 = vperm.xlu1 %2019, %v18_v0   ;;  %40 = vperm.xlu0 %2018, %v16_v1   ;;  %v19_v3 = vld [vmem:[%s3362_s1 + $0x8] sm:$0xf]  ;;  %v15_v5 = vld [vmem:[%s3363_s2] sm:$0x3f] }
   0x4   :  { %v17_v4 = vld [vmem:[%s3361_s0 + $0x8] sm:$0xf]  ;;  %v22_v6 = vrot.slane %v15_v5, 2  ;;  %v23_v7 = vrot.slane %v15_v5, 3  ;;  %v24_v8 = vrot.slane %v15_v5, 4  ;;  %v25_v9 = vrot.slane %v15_v5, 5 }
   0x5   :  { %v21_v10 = vrot.slane %v15_v5, 1  ;;  %v26_v11 = vperm.slane %v15_v5, 0  ;;  %v2047_v1 = vmov 683565275   ;;  %s2053_s0 = smov [#allocation2]   ;;  %s1960_s23 = sshll.u32 %s3364_s3, 4  ;;  %s1961_s23 = int_to_ptr.hbm [resolvable:$true] %s1960_s23 }
   0x6   :  { %v28_v12 = vperm.slane %v22_v6, 0  ;;  %v29_v13 = vperm.slane %v23_v7, 0  ;;  %v30_v14 = vperm.slane %v24_v8, 0  ;;  %v31_v15 = vperm.slane %v25_v9, 0  ;;  %s1958_s1 = sshll.u32 %s2053_s0, 4  ;;  %s2054_s24 = smov 128   ;;  %s1959_s1 = int_to_ptr.vmem [resolvable:$true] %s1958_s1 }
   0x7   :  { %v27_v18 = vperm.slane %v21_v10, 0  ;;  %v2049_v6 = vmov 2131351028   ;;  %s2055_s25 = smov 8  }
   0xb   :  { %67 = vperm.xlu1 %2019, %v19_v3   ;;  %45 = vperm.xlu0 %2018, %v17_v4   ;;  %v2048_v4 = vmov 2475754826  }
  0x75   :  { %v63_v16 = vpop.permute.xlu1 %62  ;;  %v41_v17 = vpop.permute.xlu0 %40 }
  0x76   :  { %v48_v19 = vmul.f32 %v41_v17, %v26_v11  ;;  %v52_v20 = vmul.f32 %v41_v17, %v28_v12  ;;  %v54_v21 = vmul.f32 %v41_v17, %v29_v13  ;;  %v56_v22 = vmul.f32 %v41_v17, %v30_v14 }
  0x77   :  { %v58_v23 = vmul.f32 %v41_v17, %v31_v15  ;;  %v50_v27 = vmul.f32 %v41_v17, %v27_v18  ;;  %v2052_v17 = vmov 1326507024  }
  0x78   :  { %v2093_v24 = vadd.f32 %v63_v16, %v48_v19  ;;  %v2095_v25 = vadd.f32 %v63_v16, %v52_v20  ;;  %v2097_v26 = vadd.f32 %v63_v16, %v54_v21  ;;  %v2099_v28 = vadd.f32 %v63_v16, %v56_v22 }
  0x79   :  { %v2101_v29 = vadd.f32 %v63_v16, %v58_v23  ;;  %v2107_v35 = vadd.f32 %v63_v16, %v50_v27 }
  0x7a   :  { %v82_v30 = vand.u32 2147483647, %v2093_v24  ;;  %v85_v31 = vand.u32 2139095040, %v2093_v24 }
  0x7b   :  { %v395_v55 = vand.u32 2139095040, %v2107_v35 }
  0x7c   :  { %v86_v32 = vshrl.u32 %v85_v31, 23  ;;  %v89_v33 = vand.u32 8388607, %v82_v30 }
  0x7d   :  { %v46_v34 = vpop.permute.xlu0 %45  ;;  %v68_v40 = vpop.permute.xlu1 %67  ;;  %v396_v0 = vshrl.u32 %v395_v55, 23 }
  0x7e   :  { %v49_v36 = vmul.f32 %v46_v34, %v26_v11  ;;  %v51_v37 = vmul.f32 %v46_v34, %v27_v18  ;;  %v53_v38 = vmul.f32 %v46_v34, %v28_v12  ;;  %v55_v39 = vmul.f32 %v46_v34, %v29_v13 }
  0x7f   :  { %v57_v41 = vmul.f32 %v46_v34, %v30_v14  ;;  %v59_v42 = vmul.f32 %v46_v34, %v31_v15  ;;  %v1972_v43 = vadd.s32 4294967169, %v86_v32  ;;  %v90_v44 = vor.u32 8388608, %v89_v33 }
  0x80   :  { %v2109_v45 = vadd.f32 %v68_v40, %v49_v36  ;;  %v2111_v46 = vadd.f32 %v68_v40, %v51_v37  ;;  %v2113_v47 = vadd.f32 %v68_v40, %v53_v38  ;;  %v2115_v48 = vadd.f32 %v68_v40, %v55_v39 }
  0x81   :  { %v2117_v49 = vadd.f32 %v68_v40, %v57_v41  ;;  %v2119_v50 = vadd.f32 %v68_v40, %v59_v42  ;;  %v92_v51 = vadd.s32 1, %v1972_v43  ;;  %v2123_v54 = vshll.u32 %v90_v44, 8 }
  0x82   :  { %v237_v52 = vand.u32 2147483647, %v2109_v45  ;;  %v240_v53 = vand.u32 2139095040, %v2109_v45  ;;  %v2050_v11 = vmov 2102212464  }
  0x83   :  { %vm93_vm0 = vcmp.gt.s32.totalorder %v92_v51, 0  ;;  %v2129_v62 = vand.u32 65535, %v2123_v54  ;;  %v2051_v14 = vmov 920167782   ;;  %v132_v44 = vshrl.u32 %v2123_v54, 16 }
  0x84   :  { %v94_v56 = vsel %vm93_vm0, %v92_v51, 0  ;;  %v241_v57 = vshrl.u32 %v240_v53, 23  ;;  %v244_v58 = vand.u32 8388607, %v237_v52  ;;  %vm84_vm0 = vcmp.lt.s32.totalorder %v2093_v24, 0 }
  0x85   :  { %v96_v59 = vand.u32 31, %v94_v56  ;;  %v95_v60 = vshrl.u32 %v94_v56, 5 }
  0x86   :  { %v1975_v63 = vadd.s32 4294967169, %v241_v57  ;;  %v245_v8 = vor.u32 8388608, %v244_v58 }
  0x87   :  { %v97_v61 = vsub.s32 32, %v96_v59  ;;  %v99_v3 = vshll.u32 %v2047_v1, %v96_v59  ;;  %v102_v5 = vshll.u32 %v2048_v4, %v96_v59  ;;  %v105_v7 = vshll.u32 %v2049_v6, %v96_v59 }
  0x88   :  { %v108_v13 = vshll.u32 %v2050_v11, %v96_v59  ;;  %v111_v16 = vshll.u32 %v2051_v14, %v96_v59  ;;  %vm114_vm1 = vcmp.lt.s32.totalorder %v95_v60, 1  ;;  %v247_v22 = vadd.s32 1, %v1975_v63 }
  0x89   :  { %v100_v9 = vshrl.u32 %v2048_v4, %v97_v61  ;;  %v103_v10 = vshrl.u32 %v2049_v6, %v97_v61  ;;  %v106_v12 = vshrl.u32 %v2050_v11, %v97_v61  ;;  %v109_v15 = vshrl.u32 %v2051_v14, %v97_v61 }
  0x8a   :  { %v112_v18 = vshrl.u32 %v2052_v17, %v97_v61  ;;  %vm115_vm2 = vcmp.lt.s32.totalorder %v95_v60, 2  ;;  %vm117_vm3 = vcmp.lt.s32.totalorder %v95_v60, 4  ;;  %v98_v31 = vshrl.u32 %v2047_v1, %v97_v61 }
  0x8b   :  { %v101_v19 = vor.u32 %v100_v9, %v99_v3  ;;  %v104_v20 = vor.u32 %v103_v10, %v102_v5  ;;  %v107_v21 = vor.u32 %v106_v12, %v105_v7  ;;  %v110_v23 = vor.u32 %v109_v15, %v108_v13 }
  0x8c   :  { %v113_v27 = vor.u32 %v112_v18, %v111_v16  ;;  %vm116_vm4 = vcmp.lt.s32.totalorder %v95_v60, 3  ;;  %vm248_vm5 = vcmp.gt.s32.totalorder %v247_v22, 0  ;;  %v2151_v59 = vshll.u32 %v245_v8, 8 }
  0x8d   :  { %v119_v32 = vsel %vm117_vm3, %v107_v21, 2102212464  ;;  %v122_v33 = vsel %vm114_vm1, %v101_v19, %v104_v20  ;;  %v126_v34 = vsel %vm114_vm1, %v104_v20, %v107_v21  ;;  %v123_v36 = vsel %vm117_vm3, %v110_v23, 920167782 }
  0x8e   :  { %v127_v37 = vsel %vm117_vm3, %v113_v27, 1326507024  ;;  %v118_v38 = vsel %vm114_vm1, %v98_v31, %v101_v19  ;;  %v120_v39 = vsel %vm116_vm4, %v104_v20, %v119_v32  ;;  %v124_v40 = vsel %vm116_vm4, %v107_v21, %v123_v36 }
  0x8f   :  { %v128_v41 = vsel %vm116_vm4, %v110_v23, %v127_v37  ;;  %v125_v42 = vsel %vm115_vm2, %v122_v33, %v124_v40  ;;  %v249_v51 = vsel %vm248_vm5, %v247_v22, 0  ;;  %v2149_v58 = vsel %vm115_vm2, %v118_v38, %v120_v39 }
  0x90   :  { %v129_v43 = vsel %vm115_vm2, %v126_v34, %v128_v41  ;;  %v155_v56 = vand.u32 65535, %v125_v42  ;;  %v156_v57 = vshrl.u32 %v125_v42, 16  ;;  %v392_v61 = vand.u32 2147483647, %v2107_v35 }
  0x91   :  { %v133_v53 = vand.u32 65535, %v129_v43  ;;  %v134_v55 = vshrl.u32 %v129_v43, 16  ;;  %v1978_v63 = vadd.s32 4294967169, %v396_v0  ;;  %v2155_v7 = vshrl.u32 %v249_v51, 5 }
  0x92   :  { %v251_v9 = vand.u32 31, %v249_v51  ;;  %v158_v13 = vmul.u32 %v156_v57, %v2129_v62  ;;  %v159_v15 = vmul.u32 %v155_v56, %v132_v44  ;;  %v157_v8 = vmul.u32 %v155_v56, %v2129_v62 }
  0x93   :  { %v136_v3 = vmul.u32 %v134_v55, %v2129_v62  ;;  %v137_v5 = vmul.u32 %v133_v53, %v132_v44  ;;  %v135_v10 = vmul.u32 %v133_v53, %v2129_v62  ;;  %v138_v12 = vmul.u32 %v134_v55, %v132_v44 }
  0x94   :  { %v160_v18 = vmul.u32 %v156_v57, %v132_v44  ;;  %v161_v0 = vshll.u32 %v158_v13, 16  ;;  %v162_v21 = vshrl.u32 %v158_v13, 16  ;;  %v163_v23 = vshll.u32 %v159_v15, 16 }
  0x95   :  { %v139_v60 = vshll.u32 %v136_v3, 16  ;;  %v140_v16 = vshrl.u32 %v136_v3, 16  ;;  %v141_v19 = vshll.u32 %v137_v5, 16  ;;  %v142_v20 = vshrl.u32 %v137_v5, 16 }
  0x96   :  { %v252_v27 = vsub.s32 32, %v251_v9  ;;  %v164_v32 = vshrl.u32 %v159_v15, 16  ;;  %vm165_vm7 = vc.u32 %v157_v8, %v161_v0  ;;  %v167_v33 = vadd.s32 %v161_v0, %v157_v8 }
  0x97   :  { %vm143_vm6 = vc.u32 %v135_v10, %v139_v60  ;;  %v145_v22 = vadd.s32 %v139_v60, %v135_v10  ;;  %v166_v36 = vsel %vm165_vm7, 1, %v2046_v2  ;;  %v254_v62 = vshll.u32 %v2047_v1, %v251_v9 }
  0x98   :  { %v144_v31 = vsel %vm143_vm6, 1, %v2046_v2  ;;  %v168_v38 = vadd.s32 %v166_v36, %v160_v18  ;;  %vm169_vm9 = vc.u32 %v167_v33, %v163_v23  ;;  %v257_v39 = vshll.u32 %v2048_v4, %v251_v9 }
  0x99   :  { %v146_v34 = vadd.s32 %v144_v31, %v138_v12  ;;  %vm147_vm8 = vc.u32 %v145_v22, %v141_v19  ;;  %v170_v41 = vsel %vm169_vm9, 1, %v2046_v2  ;;  %v255_v42 = vshrl.u32 %v2048_v4, %v252_v27 }
  0x9a   :  { %v148_v37 = vsel %vm147_vm8, 1, %v2046_v2  ;;  %v258_v43 = vshrl.u32 %v2049_v6, %v252_v27  ;;  %v172_v44 = vadd.s32 %v170_v41, %v168_v38  ;;  %v260_v51 = vshll.u32 %v2049_v6, %v251_v9 }
  0x9b   :  { %v150_v40 = vadd.s32 %v148_v37, %v146_v34  ;;  %v261_v53 = vshrl.u32 %v2050_v11, %v252_v27  ;;  %v263_v55 = vshll.u32 %v2050_v11, %v251_v9  ;;  %v256_v57 = vor.u32 %v255_v42, %v254_v62 }
  0x9c   :  { %v259_v3 = vor.u32 %v258_v43, %v257_v39  ;;  %v264_v5 = vshrl.u32 %v2051_v14, %v252_v27  ;;  %v173_v10 = vadd.s32 %v172_v44, %v162_v21  ;;  %v266_v13 = vshll.u32 %v2051_v14, %v251_v9 }
  0x9d   :  { %v151_v56 = vadd.s32 %v150_v40, %v140_v16  ;;  %v262_v12 = vor.u32 %v261_v53, %v260_v51  ;;  %v267_v15 = vshrl.u32 %v2052_v17, %v252_v27  ;;  %v2176_v8 = vadd.s32 %v167_v33, %v163_v23 }
  0x9e   :  { %v265_v18 = vor.u32 %v264_v5, %v263_v55  ;;  %vm269_vm10 = vcmp.lt.s32.totalorder %v2155_v7, 1  ;;  %v174_v19 = vadd.s32 %v173_v10, %v164_v32  ;;  %vm272_vm11 = vcmp.lt.s32.totalorder %v2155_v7, 4 }
  0x9f   :  { %v2174_v60 = vadd.s32 %v151_v56, %v142_v20  ;;  %v268_v0 = vor.u32 %v267_v15, %v266_v13  ;;  %v277_v16 = vsel %vm269_vm10, %v256_v57, %v259_v3  ;;  %vm271_vm13 = vcmp.lt.s32.totalorder %v2155_v7, 3 }
  0xa0   :  { %v278_v9 = vsel %vm272_vm11, %v265_v18, 920167782  ;;  %v402_v20 = vadd.s32 1, %v1978_v63  ;;  %v178_v21 = vadd.s32 1, %v174_v19  ;;  %vm270_vm14 = vcmp.lt.s32.totalorder %v2155_v7, 2 }
  0xa1   :  { %vm177_vm12 = vc.u32 %v2174_v60, %v2176_v8  ;;  %v279_v22 = vsel %vm271_vm13, %v262_v12, %v278_v9  ;;  %v281_v23 = vsel %vm269_vm10, %v259_v3, %v262_v12  ;;  %v175_v31 = vmul.u32 %v2123_v54, %v2149_v58 }
  0xa2   :  { %v280_v32 = vsel %vm270_vm14, %v277_v16, %v279_v22  ;;  %v282_v33 = vsel %vm272_vm11, %v268_v0, 1326507024  ;;  %v286_v63 = vand.u32 65535, %v2151_v59  ;;  %v179_v34 = vsel %vm177_vm12, %v178_v21, %v174_v19 }
  0xa3   :  { %v283_v36 = vsel %vm271_vm13, %v265_v18, %v282_v33  ;;  %v310_v62 = vand.u32 65535, %v280_v32  ;;  %v311_v37 = vshrl.u32 %v280_v32, 16  ;;  %v180_v38 = vadd.s32 %v179_v34, %v175_v31 }
  0xa4   :  { %v253_v39 = vshrl.u32 %v2047_v1, %v252_v27  ;;  %v284_v54 = vsel %vm270_vm14, %v281_v23, %v283_v36  ;;  %v287_v58 = vshrl.u32 %v2151_v59, 16  ;;  %v274_v40 = vsel %vm272_vm11, %v262_v12, 2102212464 }
  0xa5   :  { %v288_v41 = vand.u32 65535, %v284_v54  ;;  %v289_v42 = vshrl.u32 %v284_v54, 16  ;;  %v313_v43 = vmul.u32 %v311_v37, %v286_v63  ;;  %v181_v44 = vadd.s32 536870912, %v180_v38 }
  0xa6   :  { %v314_v51 = vmul.u32 %v310_v62, %v287_v58  ;;  %v2209_v53 = vand.u32 8388607, %v392_v61  ;;  %v273_v27 = vsel %vm269_vm10, %v253_v39, %v256_v57  ;;  %vm403_vm15 = vcmp.gt.s32.totalorder %v402_v20, 0 }
  0xa7   :  { %v291_v55 = vmul.u32 %v289_v42, %v286_v63  ;;  %v292_v56 = vmul.u32 %v288_v41, %v287_v58  ;;  %v182_v5 = vshrl.u32 %v181_v44, 30  ;;  %v275_v10 = vsel %vm271_vm13, %v259_v3, %v274_v40 }
  0xa8   :  { %v312_v12 = vmul.u32 %v310_v62, %v286_v63  ;;  %v316_v13 = vshll.u32 %v313_v43, 16  ;;  %v290_v15 = vmul.u32 %v288_v41, %v286_v63  ;;  %v293_v18 = vmul.u32 %v289_v42, %v287_v58 }
  0xa9   :  { %v294_v19 = vshll.u32 %v291_v55, 16  ;;  %v315_v0 = vmul.u32 %v311_v37, %v287_v58  ;;  %v183_v16 = vshll.u32 %v182_v5, 30  ;;  %v296_v9 = vshll.u32 %v292_v56, 16 }
  0xaa   :  { %v318_v21 = vshll.u32 %v314_v51, 16  ;;  %vm320_vm1 = vc.u32 %v312_v12, %v316_v13  ;;  %vm2218_vm2 = vcmp.le.f32.partialorder %v82_v30, 0.7853982  ;;  %v322_v23 = vadd.s32 %v316_v13, %v312_v12 }
  0xab   :  { %vm298_vm3 = vc.u32 %v290_v15, %v294_v19  ;;  %v300_v22 = vadd.s32 %v294_v19, %v290_v15  ;;  %v321_v3 = vsel %vm320_vm1, 1, %v2046_v2  ;;  %v184_v31 = vsub.s32 %v180_v38, %v183_v16 }
  0xac   :  { %v299_v32 = vsel %vm298_vm3, 1, %v2046_v2  ;;  %v323_v33 = vadd.s32 %v321_v3, %v315_v0  ;;  %v404_v63 = vsel %vm403_vm15, %v402_v20, 0  ;;  %v206_v34 = vsub.s32 4, %v182_v5 }
  0xad   :  { %v301_v36 = vadd.s32 %v299_v32, %v293_v18  ;;  %vm302_vm4 = vc.u32 %v300_v22, %v296_v9  ;;  %vm324_vm5 = vc.u32 %v322_v23, %v318_v21  ;;  %vm185_vm6 = vcmp.lt.s32.totalorder %v184_v31, 0 }
  0xae   :  { %v186_v30 = vsub.s32 0, %v184_v31  ;;  %v276_v62 = vsel %vm270_vm14, %v273_v27, %v275_v10  ;;  %v303_v37 = vsel %vm302_vm4, 1, %v2046_v2  ;;  %v295_v39 = vshrl.u32 %v291_v55, 16 }
  0xaf   :  { %v305_v54 = vadd.s32 %v303_v37, %v301_v36  ;;  %v325_v38 = vsel %vm324_vm5, 1, %v2046_v2  ;;  %v406_v58 = vand.u32 31, %v404_v63  ;;  %v297_v41 = vshrl.u32 %v292_v56, 16 }
  0xb0   :  { %v187_v40 = vsel %vm185_vm6, %v186_v30, %v184_v31  ;;  %v317_v42 = vshrl.u32 %v313_v43, 16  ;;  %v327_v20 = vadd.s32 %v325_v38, %v323_v33  ;;  %v207_v12 = vsel %vm84_vm0, %v206_v34, %v182_v5 }
  0xb1   :  { %v188_v44 = vclz %v187_v40  ;;  %v306_v13 = vadd.s32 %v305_v54, %v295_v39  ;;  %v2231_v15 = vsub.s32 32, %v406_v58  ;;  %v176_v7 = vadd.s32 %v2176_v8, %v2174_v60 }
  0xb2   :  { %v319_v27 = vshrl.u32 %v314_v51, 16  ;;  %v328_v55 = vadd.s32 %v327_v20, %v317_v42  ;;  %v330_v10 = vmul.u32 %v2151_v59, %v276_v62  ;;  %v2238_v56 = vadd.s32 %v322_v23, %v318_v21 }
  0xb3   :  { %v1973_v18 = vadd.s32 4294967294, %v188_v44  ;;  %v2236_v19 = vadd.s32 %v306_v13, %v297_v41  ;;  %v410_v43 = vshrl.u32 %v2048_v4, %v2231_v15  ;;  %v209_v5 = vsel %vm2218_vm2, 0, %v207_v12 }
  0xb4   :  { %v329_v0 = vadd.s32 %v328_v55, %v319_v27  ;;  %v2244_v16 = vshrl.u32 %v404_v63, 5  ;;  %v409_v60 = vshll.u32 %v2047_v1, %v406_v58  ;;  %v412_v59 = vshll.u32 %v2048_v4, %v406_v58 }
  0xb5   :  { %vm1974_vm7 = vcmp.lt.s32.totalorder %v1973_v18, 0  ;;  %vm332_vm8 = vc.u32 %v2236_v19, %v2238_v56  ;;  %v413_v8 = vshrl.u32 %v2049_v6, %v2231_v15  ;;  %v415_v21 = vshll.u32 %v2049_v6, %v406_v58 }
  0xb6   :  { %v191_v51 = vsel %vm1974_vm7, 0, %v1973_v18  ;;  %v333_v9 = vadd.s32 1, %v329_v0  ;;  %v416_v22 = vshrl.u32 %v2050_v11, %v2231_v15  ;;  %v411_v33 = vor.u32 %v410_v43, %v409_v60 }
  0xb7   :  { %v192_v3 = vsub.s32 32, %v191_v51  ;;  %v193_v23 = vshll.u32 %v184_v31, %v191_v51  ;;  %v196_v32 = vsub.s32 4294967266, %v191_v51  ;;  %v418_v34 = vshll.u32 %v2050_v11, %v406_v58 }
  0xb8   :  { %v334_v63 = vsel %vm332_vm8, %v333_v9, %v329_v0  ;;  %v419_v36 = vshrl.u32 %v2051_v14, %v2231_v15  ;;  %v421_v30 = vshll.u32 %v2051_v14, %v406_v58  ;;  %v422_v54 = vshrl.u32 %v2052_v17, %v2231_v15 }
  0xb9   :  { %v194_v62 = vshrl.u32 %v176_v7, %v192_v3  ;;  %v197_v37 = vadd.s32 127, %v196_v32  ;;  %v335_v39 = vadd.s32 %v334_v63, %v330_v10  ;;  %v414_v38 = vor.u32 %v413_v8, %v412_v59 }
  0xba   :  { %v417_v40 = vor.u32 %v416_v22, %v415_v21  ;;  %v420_v41 = vor.u32 %v419_v36, %v418_v34  ;;  %vm427_vm9 = vcmp.lt.s32.totalorder %v2244_v16, 4  ;;  %v423_v44 = vor.u32 %v422_v54, %v421_v30 }
  0xbb   :  { %v195_v31 = vor.u32 %v194_v62, %v193_v23  ;;  %v198_v42 = vshll.u32 %v197_v37, 23  ;;  %v336_v20 = vadd.s32 536870912, %v335_v39  ;;  %v226_v12 = vadd.s32 3, %v209_v5 }
  0xbc   :  { %v400_v13 = vor.u32 8388608, %v2209_v53  ;;  %v433_v58 = vsel %vm427_vm9, %v420_v41, 920167782  ;;  %vm424_vm10 = vcmp.lt.s32.totalorder %v2244_v16, 1  ;;  %vm426_vm11 = vcmp.lt.s32.totalorder %v2244_v16, 3 }
  0xbd   :  { %v199_v7 = vor.u32 4788187, %v198_v42  ;;  %v2265_v27 = vshrl.u32 %v336_v20, 30  ;;  %v432_v55 = vsel %vm424_vm10, %v411_v33, %v414_v38  ;;  %v434_v10 = vsel %vm426_vm11, %v417_v40, %v433_v58 }
  0xbe   :  { %v436_v18 = vsel %vm424_vm10, %v414_v38, %v417_v40  ;;  %v437_v53 = vsel %vm427_vm9, %v423_v44, 1326507024  ;;  %v202_v5 = vcvt.s32.f32 %v195_v31  ;;  %vm425_vm12 = vcmp.lt.s32.totalorder %v2244_v16, 2 }
  0xbf   :  { %v200_v43 = vand.u32 2147483647, %v199_v7  ;;  %v338_v0 = vshll.u32 %v2265_v27, 30  ;;  %v438_v60 = vsel %vm426_vm11, %v420_v41, %v437_v53  ;;  %v2281_v59 = vshll.u32 %v400_v13, 8 }
  0xc0   :  { %v435_v9 = vsel %vm425_vm12, %v432_v55, %v434_v10  ;;  %v439_v21 = vsel %vm425_vm12, %v436_v18, %v438_v60  ;;  %v2287_v22 = vand.u32 3, %v226_v12  ;;  %v429_v63 = vsel %vm427_vm9, %v417_v40, 2102212464 }
  0xc1   :  { %v203_v8 = vmul.f32 %v202_v5, %v200_v43  ;;  %v339_v51 = vsub.s32 %v335_v39, %v338_v0  ;;  %v443_v3 = vand.u32 65535, %v439_v21  ;;  %v441_v34 = vand.u32 65535, %v2281_v59 }
  0xc2   :  { %v442_v36 = vshrl.u32 %v2281_v59, 16  ;;  %v444_v30 = vshrl.u32 %v439_v21, 16  ;;  %v465_v62 = vand.u32 65535, %v435_v9  ;;  %v408_v54 = vshrl.u32 %v2047_v1, %v2231_v15 }
  0xc3   :  { %v204_v23 = vxor.u32 2147483648, %v203_v8  ;;  %vm340_vm13 = vcmp.lt.s32.totalorder %v339_v51, 0  ;;  %v341_v32 = vsub.s32 0, %v339_v51  ;;  %v466_v41 = vshrl.u32 %v435_v9, 16 }
  0xc4   :  { %v446_v42 = vmul.u32 %v444_v30, %v441_v34  ;;  %v2302_v20 = vmul.u32 %v443_v3, %v442_v36  ;;  %v331_v12 = vadd.s32 %v2238_v56, %v2236_v19  ;;  %v2310_v13 = vsel %vm424_vm10, %v408_v54, %v411_v33 }
  0xc5   :  { %v205_v37 = vsel %vm84_vm0, %v204_v23, %v203_v8  ;;  %v342_v39 = vsel %vm340_vm13, %v341_v32, %v339_v51  ;;  %v2314_v15 = vsel %vm426_vm11, %v414_v38, %v429_v63  ;;  %v445_v58 = vmul.u32 %v443_v3, %v441_v34 }
  0xc6   :  { %v2300_v31 = vsel %vm2218_vm2, %v2093_v24, %v205_v37  ;;  %v343_v40 = vclz %v342_v39  ;;  %v449_v7 = vshll.u32 %v446_v42, 16  ;;  %v467_v55 = vmul.u32 %v465_v62, %v441_v34 }
  0xc7   :  { %v210_v44 = vmul.f32 %v2300_v31, %v2300_v31  ;;  %v448_v53 = vmul.u32 %v444_v30, %v442_v36  ;;  %v2316_v43 = vmul.u32 %v466_v41, %v441_v34  ;;  %vm239_vm14 = vcmp.lt.s32.totalorder %v2109_v45, 0 }
  0xc8   :  { %v1976_v57 = vadd.s32 4294967294, %v343_v40  ;;  %v451_v19 = vshll.u32 %v2302_v20, 16  ;;  %vm453_vm0 = vc.u32 %v445_v58, %v449_v7  ;;  %v455_v56 = vadd.s32 %v449_v7, %v445_v58 }
  0xc9   :  { %v211_v10 = vmul.f32 -0.001358992, %v210_v44  ;;  %v218_v18 = vmul.f32 -0.00019511016, %v210_v44  ;;  %v454_v0 = vsel %vm453_vm0, 1, %v2046_v2  ;;  %v469_v21 = vmul.u32 %v465_v62, %v442_v36 }
  0xca   :  { %vm1977_vm15 = vcmp.lt.s32.totalorder %v1976_v57, 0  ;;  %v456_v9 = vadd.s32 %v454_v0, %v448_v53  ;;  %vm457_vm1 = vc.u32 %v455_v56, %v451_v19  ;;  %v471_v32 = vshll.u32 %v2316_v43, 16 }
  0xcb   :  { %v212_v33 = vadd.f32 0.041655596, %v211_v10  ;;  %v219_v5 = vadd.f32 0.008332121, %v218_v18  ;;  %v346_v38 = vsel %vm1977_vm15, 0, %v1976_v57  ;;  %v458_v39 = vsel %vm457_vm1, 1, %v2046_v2 }
  0xcc   :  { %v347_v60 = vsub.s32 32, %v346_v38  ;;  %v351_v8 = vsub.s32 4294967266, %v346_v38  ;;  %vm2324_vm2 = vcmp.le.f32.partialorder %v237_v52, 0.7853982  ;;  %v348_v34 = vshll.u32 %v339_v51, %v346_v38 }
  0xcd   :  { %v213_v3 = vmul.f32 %v212_v33, %v210_v44  ;;  %v220_v23 = vmul.f32 %v219_v5, %v210_v44  ;;  %v361_v62 = vsub.s32 4, %v2265_v27  ;;  %v460_v57 = vadd.s32 %v458_v39, %v456_v9 }
  0xce   :  { %v349_v30 = vshrl.u32 %v331_v12, %v347_v60  ;;  %v352_v37 = vadd.s32 127, %v351_v8  ;;  %vm229_vm3 = vcmp.eq.s32.totalorder %v2287_v22, 0  ;;  %v470_v10 = vmul.u32 %v466_v41, %v442_v36 }
  0xcf   :  { %v214_v54 = vadd.f32 -0.4999988, %v213_v3  ;;  %v221_v40 = vadd.f32 -0.16666654, %v220_v23  ;;  %vm475_vm4 = vc.u32 %v467_v55, %v471_v32  ;;  %vm228_vm5 = vcmp.lt.s32.totalorder %v2287_v22, 2 }
  0xd0   :  { %v350_v58 = vor.u32 %v349_v30, %v348_v34  ;;  %v353_v7 = vshll.u32 %v352_v37, 23  ;;  %v450_v51 = vshrl.u32 %v446_v42, 16  ;;  %v476_v12 = vsel %vm475_vm4, 1, %v2046_v2 }
  0xd1   :  { %v215_v52 = vmul.f32 %v214_v54, %v210_v44  ;;  %v222_v18 = vmul.f32 %v221_v40, %v210_v44  ;;  %vm225_vm6 = vweird.f32 %v2093_v24  ;;  %v473_v19 = vshll.u32 %v469_v21, 16 }
  0xd2   :  { %v354_v53 = vor.u32 4788187, %v353_v7  ;;  %v477_v56 = vadd.s32 %v471_v32, %v467_v55  ;;  %v478_v33 = vadd.s32 %v476_v12, %v470_v10  ;;  %v362_v36 = vsel %vm239_vm14, %v361_v62, %v2265_v27 }
  0xd3   :  { %v216_v5 = vadd.f32 1.0, %v215_v52  ;;  %v223_v38 = vadd.f32 1.0, %v222_v18  ;;  %v461_v41 = vadd.s32 %v460_v57, %v450_v51  ;;  %v357_v44 = vcvt.s32.f32 %v350_v58 }
  0xd4   :  { %v355_v0 = vand.u32 2147483647, %v354_v53  ;;  %v452_v60 = vshrl.u32 %v2302_v20, 16  ;;  %vm479_vm7 = vc.u32 %v477_v56, %v473_v19  ;;  %v547_v55 = vand.u32 2147483647, %v2111_v46 }
  0xd5   :  { %v224_v42 = vmul.f32 %v223_v38, %v2300_v31  ;;  %v233_v8 = vxor.u32 2147483648, %v216_v5  ;;  %v480_v9 = vsel %vm479_vm7, 1, %v2046_v2  ;;  %vm232_vm8 = vcmp.eq.s32.totalorder %v2287_v22, 2 }
  0xd6   :  { %v358_v3 = vmul.f32 %v357_v44, %v355_v0  ;;  %v472_v23 = vshrl.u32 %v2316_v43, 16  ;;  %v482_v32 = vadd.s32 %v480_v9, %v478_v33  ;;  %v364_v34 = vsel %vm2324_vm2, 0, %v362_v36 }
  0xd7   :  { %v230_v27 = vxor.u32 2147483648, %v224_v42  ;;  %v431_v31 = vsel %vm425_vm12, %v2310_v13, %v2314_v15  ;;  %v462_v20 = vadd.s32 %v461_v41, %v452_v60  ;;  %v474_v37 = vshrl.u32 %v469_v21, 16 }
  0xd8   :  { %v359_v30 = vxor.u32 2147483648, %v358_v3  ;;  %v483_v39 = vadd.s32 %v482_v32, %v472_v23  ;;  %v550_v54 = vand.u32 2139095040, %v2111_v46  ;;  %v234_v43 = vsel %vm232_vm8, %v233_v8, %v224_v42 }
  0xd9   :  { %v231_v40 = vsel %vm229_vm3, %v216_v5, %v230_v27  ;;  %v481_v62 = vadd.s32 %v477_v56, %v473_v19  ;;  %v554_v57 = vand.u32 8388607, %v547_v55  ;;  %v705_v51 = vand.u32 2139095040, %v2095_v25 }
  0xda   :  { %v235_v58 = vsel %vm228_vm5, %v231_v40, %v234_v43  ;;  %v360_v16 = vsel %vm239_vm14, %v359_v30, %v358_v3  ;;  %v484_v13 = vadd.s32 %v483_v39, %v474_v37  ;;  %v551_v15 = vshrl.u32 %v550_v54, 23 }
  0xdb   :  { %v236_v21 = vsel %vm225_vm6, nan, %v235_v58  ;;  %v363_v7 = vsel %vm2324_vm2, %v2109_v45, %v360_v16  ;;  %vm487_vm9 = vc.u32 %v462_v20, %v481_v62  ;;  %v381_v22 = vadd.s32 3, %v364_v34 }
  0xdc   :  { %v365_v10 = vmul.f32 %v363_v7, %v363_v7  ;;  %v488_v52 = vadd.s32 1, %v484_v13  ;;  %v1981_v18 = vadd.s32 4294967169, %v551_v15  ;;  %1942 = vst [vmem:[#allocation2] sm:$0xff] %v236_v21  ;;  %v485_v12 = vmul.u32 %v2281_v59, %v431_v31 }
  0xdd   :  { %v555_v53 = vor.u32 8388608, %v554_v57  ;;  %v706_v38 = vshrl.u32 %v705_v51, 23  ;;  %v382_v41 = vand.u32 3, %v381_v22  ;;  %v702_v60 = vand.u32 2147483647, %v2095_v25 }
  0xde   :  { %v366_v19 = vmul.f32 -0.001358992, %v365_v10  ;;  %v373_v56 = vmul.f32 -0.00019511016, %v365_v10  ;;  %v489_v33 = vsel %vm487_vm9, %v488_v52, %v484_v13  ;;  %v557_v24 = vadd.s32 1, %v1981_v18 }
  0xdf   :  { %v490_v5 = vadd.s32 %v489_v33, %v485_v12  ;;  %v2366_v3 = vshll.u32 %v555_v53, 8  ;;  %v1984_v23 = vadd.s32 4294967169, %v706_v38  ;;  %vm394_vm11 = vcmp.lt.s32.totalorder %v2107_v35, 0 }
  0xe0   :  { %v367_v36 = vadd.f32 0.041655596, %v366_v19  ;;  %v374_v63 = vadd.f32 0.008332121, %v373_v56  ;;  %vm558_vm10 = vcmp.gt.s32.totalorder %v557_v24, 0  ;;  %vm384_vm12 = vcmp.eq.s32.totalorder %v382_v41, 0 }
  0xe1   :  { %v491_v0 = vadd.s32 536870912, %v490_v5  ;;  %v559_v44 = vsel %vm558_vm10, %v557_v24, 0  ;;  %vm387_vm13 = vcmp.eq.s32.totalorder %v382_v41, 2  ;;  %v2369_v34 = vadd.s32 %v481_v62, %v462_v20 }
  0xe2   :  { %v368_v42 = vmul.f32 %v367_v36, %v365_v10  ;;  %v375_v8 = vmul.f32 %v374_v63, %v365_v10  ;;  %v561_v9 = vand.u32 31, %v559_v44  ;;  %v2373_v37 = vand.u32 8388607, %v702_v60 }
  0xe3   :  { %v492_v59 = vshrl.u32 %v491_v0, 30  ;;  %vm383_vm14 = vcmp.lt.s32.totalorder %v382_v41, 2  ;;  %vm2377_vm15 = vcmp.le.f32.partialorder %v392_v61, 0.7853982  ;;  %v2382_v43 = vand.u32 65535, %v2366_v3 }
  0xe4   :  { %v369_v32 = vadd.f32 -0.4999988, %v368_v42  ;;  %v376_v27 = vadd.f32 -0.16666654, %v375_v8  ;;  %v562_v30 = vsub.s32 32, %v561_v9  ;;  %v2385_v20 = vshrl.u32 %v2366_v3, 16 }
  0xe5   :  { %v493_v31 = vshll.u32 %v492_v59, 30  ;;  %vm380_vm0 = vweird.f32 %v2109_v45  ;;  %v2388_v57 = vshrl.u32 %v559_v44, 5  ;;  %v564_v58 = vshll.u32 %v2047_v1, %v561_v9 }
  0xe6   :  { %v370_v39 = vmul.f32 %v369_v32, %v365_v10  ;;  %v377_v54 = vmul.f32 %v376_v27, %v365_v10  ;;  %v2391_v16 = vadd.s32 1, %v1984_v23  ;;  %v516_v15 = vsub.s32 4, %v492_v59 }
  0xe7   :  { %v494_v62 = vsub.s32 %v490_v5, %v493_v31  ;;  %v567_v21 = vshll.u32 %v2048_v4, %v561_v9  ;;  %v565_v52 = vshrl.u32 %v2048_v4, %v562_v30  ;;  %v568_v18 = vshrl.u32 %v2049_v6, %v562_v30 }
  0xe8   :  { %v371_v13 = vadd.f32 1.0, %v370_v39  ;;  %v378_v61 = vadd.f32 1.0, %v377_v54  ;;  %v570_v12 = vshll.u32 %v2049_v6, %v561_v9  ;;  %v571_v53 = vshrl.u32 %v2050_v11, %v562_v30 }
  0xe9   :  { %vm495_vm1 = vcmp.lt.s32.totalorder %v494_v62, 0  ;;  %v496_v10 = vsub.s32 0, %v494_v62  ;;  %v563_v56 = vshrl.u32 %v2047_v1, %v562_v30  ;;  %v573_v33 = vshll.u32 %v2050_v11, %v561_v9 }
  0xea   :  { %v379_v51 = vmul.f32 %v378_v61, %v363_v7  ;;  %v388_v22 = vxor.u32 2147483648, %v371_v13  ;;  %v574_v24 = vshrl.u32 %v2051_v14, %v562_v30  ;;  %v517_v36 = vsel %vm394_vm11, %v516_v15, %v492_v59 }
  0xeb   :  { %v497_v19 = vsel %vm495_vm1, %v496_v10, %v494_v62  ;;  %v577_v63 = vshrl.u32 %v2052_v17, %v562_v30  ;;  %v566_v7 = vor.u32 %v565_v52, %v564_v58  ;;  %v569_v0 = vor.u32 %v568_v18, %v567_v21 }
  0xec   :  { %v385_v5 = vxor.u32 2147483648, %v379_v51  ;;  %v498_v38 = vclz %v497_v19  ;;  %v575_v44 = vor.u32 %v574_v24, %v573_v33  ;;  %v576_v42 = vshll.u32 %v2051_v14, %v561_v9 }
  0xed   :  { %v389_v23 = vsel %vm387_vm13, %v388_v22, %v379_v51  ;;  %v572_v27 = vor.u32 %v571_v53, %v570_v12  ;;  %v519_v39 = vsel %vm2377_vm15, 0, %v517_v36  ;;  %vm579_vm2 = vcmp.lt.s32.totalorder %v2388_v57, 1 }
  0xee   :  { %v386_v8 = vsel %vm384_vm12, %v371_v13, %v385_v5  ;;  %v1979_v32 = vadd.s32 4294967294, %v498_v38  ;;  %v578_v54 = vor.u32 %v577_v63, %v576_v42  ;;  %vm580_vm4 = vcmp.lt.s32.totalorder %v2388_v57, 2 }
  0xef   :  { %v390_v31 = vsel %vm383_vm14, %v386_v8, %v389_v23  ;;  %vm582_vm5 = vcmp.lt.s32.totalorder %v2388_v57, 4  ;;  %vm581_vm6 = vcmp.lt.s32.totalorder %v2388_v57, 3  ;;  %v587_v41 = vsel %vm579_vm2, %v566_v7, %v569_v0 }
  0xf0   :  { %v391_v59 = vsel %vm380_vm0, nan, %v390_v31  ;;  %vm1980_vm3 = vcmp.lt.s32.totalorder %v1979_v32, 0  ;;  %v588_v30 = vsel %vm582_vm5, %v575_v44, 920167782  ;;  %v583_v61 = vsel %vm579_vm2, %v563_v56, %v566_v7 }
  0xf1   :  { %v501_v9 = vsel %vm1980_vm3, 0, %v1979_v32  ;;  %1943 = vst [vmem:[#allocation2 + $0x8] sm:$0xf] %v391_v59  ;;  %v584_v45 = vsel %vm582_vm5, %v572_v27, 2102212464  ;;  %v589_v21 = vsel %vm581_vm6, %v572_v27, %v588_v30  ;;  %v591_v10 = vsel %vm579_vm2, %v569_v0, %v572_v27 }
  0xf2   :  { %v502_v58 = vsub.s32 32, %v501_v9  ;;  %v506_v13 = vsub.s32 4294967266, %v501_v9  ;;  %v503_v15 = vshll.u32 %v494_v62, %v501_v9  ;;  %v592_v52 = vsel %vm582_vm5, %v578_v54, 1326507024 }
  0xf3   :  { %v590_v22 = vsel %vm580_vm4, %v587_v41, %v589_v21  ;;  %v593_v12 = vsel %vm581_vm6, %v575_v44, %v592_v52  ;;  %v585_v53 = vsel %vm581_vm6, %v569_v0, %v584_v45  ;;  %v710_v7 = vor.u32 8388608, %v2373_v37 }
  0xf4   :  { %v504_v18 = vshrl.u32 %v2369_v34, %v502_v58  ;;  %v507_v51 = vadd.s32 127, %v506_v13  ;;  %v594_v62 = vsel %vm580_vm4, %v591_v10, %v593_v12  ;;  %v620_v19 = vand.u32 65535, %v590_v22 }
  0xf5   :  { %v621_v56 = vshrl.u32 %v590_v22, 16  ;;  %v598_v5 = vand.u32 65535, %v594_v62  ;;  %v599_v38 = vshrl.u32 %v594_v62, 16  ;;  %v2433_v34 = vadd.s32 3, %v519_v39 }
  0xf6   :  { %v505_v33 = vor.u32 %v504_v18, %v503_v15  ;;  %v508_v24 = vshll.u32 %v507_v51, 23  ;;  %v624_v63 = vmul.u32 %v620_v19, %v2385_v20  ;;  %v2440_v0 = vsel %vm580_vm4, %v583_v61, %v585_v53 }
  0xf7   :  { %v623_v36 = vmul.u32 %v621_v56, %v2382_v43  ;;  %v601_v42 = vmul.u32 %v599_v38, %v2382_v43  ;;  %vm713_vm7 = vcmp.gt.s32.totalorder %v2391_v16, 0  ;;  %v602_v8 = vmul.u32 %v598_v5, %v2385_v20 }
  0xf8   :  { %v509_v44 = vor.u32 4788187, %v508_v24  ;;  %v622_v23 = vmul.u32 %v620_v19, %v2382_v43  ;;  %v625_v32 = vmul.u32 %v621_v56, %v2385_v20  ;;  %v512_v39 = vcvt.s32.f32 %v505_v33 }
  0xf9   :  { %v626_v27 = vshll.u32 %v623_v36, 16  ;;  %v600_v54 = vmul.u32 %v598_v5, %v2382_v43  ;;  %v604_v59 = vshll.u32 %v601_v42, 16  ;;  %v603_v57 = vmul.u32 %v599_v38, %v2385_v20 }
  0xfa   :  { %v510_v31 = vand.u32 2147483647, %v509_v44  ;;  %v606_v9 = vshll.u32 %v602_v8, 16  ;;  %v628_v41 = vshll.u32 %v624_v63, 16  ;;  %v714_v21 = vsel %vm713_vm7, %v2391_v16, 0 }
  0xfb   :  { %vm630_vm8 = vc.u32 %v622_v23, %v626_v27  ;;  %vm608_vm9 = vc.u32 %v600_v54, %v604_v59  ;;  %v610_v58 = vadd.s32 %v604_v59, %v600_v54  ;;  %v632_v45 = vadd.s32 %v626_v27, %v622_v23 }
  0xfc   :  { %v513_v30 = vmul.f32 %v512_v39, %v510_v31  ;;  %v631_v13 = vsel %vm630_vm8, 1, %v2046_v2  ;;  %v609_v61 = vsel %vm608_vm9, 1, %v2046_v2  ;;  %v640_v20 = vmul.u32 %v2366_v3, %v2440_v0 }
  0xfd   :  { %v633_v15 = vadd.s32 %v631_v13, %v625_v32  ;;  %v611_v10 = vadd.s32 %v609_v61, %v603_v57  ;;  %vm612_vm10 = vc.u32 %v610_v58, %v606_v9  ;;  %v627_v18 = vshrl.u32 %v623_v36, 16 }
  0xfe   :  { %v514_v43 = vxor.u32 2147483648, %v513_v30  ;;  %v613_v52 = vsel %vm612_vm10, 1, %v2046_v2  ;;  %vm634_vm12 = vc.u32 %v632_v45, %v628_v41  ;;  %v716_v51 = vand.u32 31, %v714_v21 }
  0xff   :  { %v605_v12 = vshrl.u32 %v601_v42, 16  ;;  %v615_v53 = vadd.s32 %v613_v52, %v611_v10  ;;  %v635_v62 = vsel %vm634_vm12, 1, %v2046_v2  ;;  %v607_v19 = vshrl.u32 %v602_v8, 16 }
 0x100   :  { %v515_v22 = vsel %vm394_vm11, %v514_v43, %v513_v30  ;;  %v637_v56 = vadd.s32 %v635_v62, %v633_v15  ;;  %v2463_v33 = vsub.s32 32, %v716_v51  ;;  %v629_v5 = vshrl.u32 %v624_v63, 16 }
 0x101   :  { %v518_v16 = vsel %vm2377_vm15, %v2107_v35, %v515_v22  ;;  %v616_v24 = vadd.s32 %v615_v53, %v605_v12  ;;  %v2465_v38 = vshrl.u32 %v714_v21, 5  ;;  %v2467_v36 = vadd.s32 %v632_v45, %v628_v41 }
 0x102   :  { %v520_v3 = vmul.f32 %v518_v16, %v518_v16  ;;  %v638_v44 = vadd.s32 %v637_v56, %v627_v18  ;;  %v720_v0 = vshrl.u32 %v2048_v4, %v2463_v33  ;;  %v723_v42 = vshrl.u32 %v2049_v6, %v2463_v33 }
 0x103   :  { %v2473_v8 = vadd.s32 %v616_v24, %v607_v19  ;;  %v719_v32 = vshll.u32 %v2047_v1, %v716_v51  ;;  %v722_v63 = vshll.u32 %v2048_v4, %v716_v51  ;;  %v725_v31 = vshll.u32 %v2049_v6, %v716_v51 }
 0x104   :  { %v521_v40 = vmul.f32 -0.001358992, %v520_v3  ;;  %v528_v23 = vmul.f32 -0.00019511016, %v520_v3  ;;  %v639_v27 = vadd.s32 %v638_v44, %v629_v5  ;;  %v726_v39 = vshrl.u32 %v2050_v11, %v2463_v33 }
 0x105   :  { %vm642_vm11 = vc.u32 %v2473_v8, %v2467_v36  ;;  %v2482_v57 = vor.u32 %v720_v0, %v719_v32  ;;  %v2484_v41 = vor.u32 %v723_v42, %v722_v63  ;;  %v728_v30 = vshll.u32 %v2050_v11, %v716_v51 }
 0x106   :  { %v522_v54 = vadd.f32 0.041655596, %v521_v40  ;;  %v529_v59 = vadd.f32 0.008332121, %v528_v23  ;;  %v643_v9 = vadd.s32 1, %v639_v27  ;;  %v729_v58 = vshrl.u32 %v2051_v14, %v2463_v33 }
 0x107   :  { %v731_v45 = vshll.u32 %v2051_v14, %v716_v51  ;;  %v732_v15 = vshrl.u32 %v2052_v17, %v2463_v33  ;;  %v727_v43 = vor.u32 %v726_v39, %v725_v31  ;;  %vm737_vm13 = vcmp.lt.s32.totalorder %v2465_v38, 4 }
 0x108   :  { %v523_v13 = vmul.f32 %v522_v54, %v520_v3  ;;  %v530_v61 = vmul.f32 %v529_v59, %v520_v3  ;;  %v644_v21 = vsel %vm642_vm11, %v643_v9, %v639_v27  ;;  %v730_v10 = vor.u32 %v729_v58, %v728_v30 }
 0x109   :  { %v645_v22 = vadd.s32 %v644_v21, %v640_v20  ;;  %v733_v12 = vor.u32 %v732_v15, %v731_v45  ;;  %vm734_vm14 = vcmp.lt.s32.totalorder %v2465_v38, 1  ;;  %vm736_vm15 = vcmp.lt.s32.totalorder %v2465_v38, 3 }
 0x10a   :  { %v524_v52 = vadd.f32 -0.4999988, %v523_v13  ;;  %v531_v18 = vadd.f32 -0.16666654, %v530_v61  ;;  %v743_v53 = vsel %vm737_vm13, %v730_v10, 920167782  ;;  %v742_v20 = vsel %vm734_vm14, %v2482_v57, %v2484_v41 }
 0x10b   :  { %v2499_v51 = vshll.u32 %v710_v7, 8  ;;  %v646_v56 = vadd.s32 536870912, %v645_v22  ;;  %v537_v24 = vand.u32 3, %v2433_v34  ;;  %vm735_vm0 = vcmp.lt.s32.totalorder %v2465_v38, 2 }
 0x10c   :  { %v525_v62 = vmul.f32 %v524_v52, %v520_v3  ;;  %v532_v19 = vmul.f32 %v531_v18, %v520_v3  ;;  %v744_v5 = vsel %vm736_vm15, %v727_v43, %v743_v53  ;;  %v747_v37 = vsel %vm737_vm13, %v733_v12, 1326507024 }
 0x10d   :  { %v2511_v0 = vshrl.u32 %v646_v56, 30  ;;  %v746_v3 = vsel %vm734_vm14, %v2484_v41, %v727_v43  ;;  %v745_v42 = vsel %vm735_vm0, %v742_v20, %v744_v5  ;;  %v748_v34 = vsel %vm736_vm15, %v730_v10, %v747_v37 }
 0x10e   :  { %v526_v7 = vadd.f32 1.0, %v525_v62  ;;  %v533_v44 = vadd.f32 1.0, %v532_v19  ;;  %vm538_vm1 = vcmp.lt.s32.totalorder %v537_v24, 2  ;;  %vm539_vm2 = vcmp.eq.s32.totalorder %v537_v24, 0 }
 0x10f   :  { %v648_v32 = vshll.u32 %v2511_v0, 30  ;;  %vm542_vm3 = vcmp.eq.s32.totalorder %v537_v24, 2  ;;  %v749_v27 = vsel %vm735_vm0, %v746_v3, %v748_v34  ;;  %v751_v39 = vand.u32 65535, %v2499_v51 }
 0x110   :  { %v534_v40 = vmul.f32 %v533_v44, %v518_v16  ;;  %v543_v23 = vxor.u32 2147483648, %v526_v7  ;;  %v776_v54 = vshrl.u32 %v745_v42, 16  ;;  %v752_v59 = vshrl.u32 %v2499_v51, 16 }
 0x111   :  { %v649_v31 = vsub.s32 %v645_v22, %v648_v32  ;;  %v753_v9 = vand.u32 65535, %v749_v27  ;;  %v754_v30 = vshrl.u32 %v749_v27, 16  ;;  %v775_v58 = vand.u32 65535, %v745_v42 }
 0x112   :  { %v540_v63 = vxor.u32 2147483648, %v534_v40  ;;  %v544_v13 = vsel %vm542_vm3, %v543_v23, %v534_v40  ;;  %vm535_vm5 = vweird.f32 %v2107_v35  ;;  %v778_v18 = vmul.u32 %v776_v54, %v751_v39 }
 0x113   :  { %vm650_vm4 = vcmp.lt.s32.totalorder %v649_v31, 0  ;;  %v651_v61 = vsub.s32 0, %v649_v31  ;;  %v756_v15 = vmul.u32 %v754_v30, %v751_v39  ;;  %v757_v21 = vmul.u32 %v753_v9, %v752_v59 }
 0x114   :  { %v541_v16 = vsel %vm539_vm2, %v526_v7, %v540_v63  ;;  %v755_v12 = vmul.u32 %v753_v9, %v751_v39  ;;  %v779_v62 = vmul.u32 %v775_v58, %v752_v59  ;;  %v641_v19 = vadd.s32 %v2467_v36, %v2473_v8 }
 0x115   :  { %v545_v45 = vsel %vm538_vm1, %v541_v16, %v544_v13  ;;  %v652_v52 = vsel %vm650_vm4, %v651_v61, %v649_v31  ;;  %v759_v53 = vshll.u32 %v756_v15, 16  ;;  %v718_v56 = vshrl.u32 %v2047_v1, %v2463_v33 }
 0x116   :  { %v546_v10 = vsel %vm535_vm5, nan, %v545_v45  ;;  %v653_v22 = vclz %v652_v52  ;;  %v739_v35 = vsel %vm737_vm13, %v727_v43, 2102212464  ;;  %v758_v20 = vmul.u32 %v754_v30, %v752_v59 }
 0x117   :  { %1944 = vst [vmem:[#allocation2 + $0x10] sm:$0xff] %v546_v10  ;;  %vm549_vm6 = vcmp.lt.s32.totalorder %v2111_v46, 0  ;;  %v761_v5 = vshll.u32 %v757_v21, 16  ;;  %vm763_vm7 = vc.u32 %v755_v12, %v759_v53  ;;  %v765_v37 = vadd.s32 %v759_v53, %v755_v12 }
 0x118   :  { %v1982_v24 = vadd.s32 4294967294, %v653_v22  ;;  %v760_v7 = vshrl.u32 %v756_v15, 16  ;;  %v764_v44 = vsel %vm763_vm7, 1, %v2046_v2  ;;  %v777_v3 = vmul.u32 %v775_v58, %v751_v39 }
 0x119   :  { %v781_v42 = vshll.u32 %v778_v18, 16  ;;  %v766_v36 = vadd.s32 %v764_v44, %v758_v20  ;;  %vm767_vm9 = vc.u32 %v765_v37, %v761_v5  ;;  %v783_v8 = vshll.u32 %v779_v62, 16 }
 0x11a   :  { %vm1983_vm8 = vcmp.lt.s32.totalorder %v1982_v24, 0  ;;  %v768_v34 = vsel %vm767_vm9, 1, %v2046_v2  ;;  %v780_v27 = vmul.u32 %v776_v54, %v752_v59  ;;  %v671_v9 = vsub.s32 4, %v2511_v0 }
 0x11b   :  { %v656_v33 = vsel %vm1983_vm8, 0, %v1982_v24  ;;  %vm785_vm10 = vc.u32 %v777_v3, %v781_v42  ;;  %v787_v43 = vadd.s32 %v781_v42, %v777_v3  ;;  %v770_v32 = vadd.s32 %v768_v34, %v766_v36 }
 0x11c   :  { %v657_v40 = vsub.s32 32, %v656_v33  ;;  %v661_v23 = vsub.s32 4294967266, %v656_v33  ;;  %v658_v63 = vshll.u32 %v649_v31, %v656_v33  ;;  %v786_v30 = vsel %vm785_vm10, 1, %v2046_v2 }
 0x11d   :  { %vm789_vm12 = vc.u32 %v787_v43, %v783_v8  ;;  %v771_v16 = vadd.s32 %v770_v32, %v760_v7  ;;  %v788_v13 = vadd.s32 %v786_v30, %v780_v27  ;;  %v738_v61 = vsel %vm734_vm14, %v718_v56, %v2482_v57 }
 0x11e   :  { %v659_v39 = vshrl.u32 %v641_v19, %v657_v40  ;;  %v662_v58 = vadd.s32 127, %v661_v23  ;;  %v762_v45 = vshrl.u32 %v757_v21, 16  ;;  %v790_v15 = vsel %vm789_vm12, 1, %v2046_v2 }
 0x11f   :  { %v857_v10 = vand.u32 2147483647, %v2113_v47  ;;  %v782_v59 = vshrl.u32 %v778_v18, 16  ;;  %v792_v52 = vadd.s32 %v790_v15, %v788_v13  ;;  %v672_v22 = vsel %vm549_vm6, %v671_v9, %v2511_v0 }
 0x120   :  { %v660_v54 = vor.u32 %v659_v39, %v658_v63  ;;  %v663_v31 = vshll.u32 %v662_v58, 23  ;;  %v740_v12 = vsel %vm736_vm15, %v2484_v41, %v739_v35  ;;  %v772_v53 = vadd.s32 %v771_v16, %v762_v45 }
 0x121   :  { %v860_v57 = vand.u32 2139095040, %v2113_v47  ;;  %v784_v19 = vshrl.u32 %v779_v62, 16  ;;  %v793_v56 = vadd.s32 %v792_v52, %v782_v59  ;;  %v864_v20 = vand.u32 8388607, %v857_v10 }
 0x122   :  { %v664_v21 = vor.u32 4788187, %v663_v31  ;;  %vm2554_vm11 = vcmp.le.f32.partialorder %v547_v55, 0.7853982  ;;  %v791_v0 = vadd.s32 %v787_v43, %v783_v8  ;;  %v667_v37 = vcvt.s32.f32 %v660_v54 }
 0x123   :  { %v861_v24 = vshrl.u32 %v860_v57, 23  ;;  %v741_v41 = vsel %vm735_vm0, %v738_v61, %v740_v12  ;;  %v794_v35 = vadd.s32 %v793_v56, %v784_v19  ;;  %v674_v62 = vsel %vm2554_vm11, 0, %v672_v22 }
 0x124   :  { %v665_v5 = vand.u32 2147483647, %v664_v21  ;;  %vm797_vm13 = vc.u32 %v772_v53, %v791_v0  ;;  %v865_v42 = vor.u32 8388608, %v864_v20  ;;  %v1012_v55 = vand.u32 2147483647, %v2097_v26 }
 0x125   :  { %v1987_v7 = vadd.s32 4294967169, %v861_v24  ;;  %v798_v3 = vadd.s32 1, %v794_v35  ;;  %v795_v36 = vmul.u32 %v2499_v51, %v741_v41  ;;  %v1015_v33 = vand.u32 2139095040, %v2097_v26 }
 0x126   :  { %v668_v44 = vmul.f32 %v667_v37, %v665_v5  ;;  %v691_v38 = vadd.s32 3, %v674_v62  ;;  %v2567_v27 = vshll.u32 %v865_v42, 8  ;;  %v2571_v63 = vand.u32 8388607, %v1012_v55 }
 0x127   :  { %v867_v8 = vadd.s32 1, %v1987_v7  ;;  %v799_v43 = vsel %vm797_vm13, %v798_v3, %v794_v35  ;;  %v1016_v39 = vshrl.u32 %v1015_v33, 23  ;;  %vm704_vm15 = vcmp.lt.s32.totalorder %v2095_v25, 0 }
 0x128   :  { %v669_v34 = vxor.u32 2147483648, %v668_v44  ;;  %v800_v40 = vadd.s32 %v799_v43, %v795_v36  ;;  %v2576_v16 = vand.u32 3, %v691_v38  ;;  %v2579_v54 = vadd.s32 %v791_v0, %v772_v53 }
 0x129   :  { %vm868_vm14 = vcmp.gt.s32.totalorder %v867_v8, 0  ;;  %v2582_v31 = vand.u32 65535, %v2567_v27  ;;  %v2585_v52 = vshrl.u32 %v2567_v27, 16  ;;  %v1990_v22 = vadd.s32 4294967169, %v1016_v39 }
 0x12a   :  { %v670_v23 = vsel %vm549_vm6, %v669_v34, %v668_v44  ;;  %v869_v32 = vsel %vm868_vm14, %v867_v8, 0  ;;  %v801_v9 = vadd.s32 536870912, %v800_v40  ;;  %v1020_v12 = vor.u32 8388608, %v2571_v63 }
 0x12b   :  { %v673_v51 = vsel %vm2554_vm11, %v2111_v46, %v670_v23  ;;  %v871_v30 = vand.u32 31, %v869_v32  ;;  %vm2590_vm0 = vcmp.le.f32.partialorder %v702_v60, 0.7853982  ;;  %v2594_v56 = vshrl.u32 %v869_v32, 5 }
 0x12c   :  { %v675_v58 = vmul.f32 %v673_v51, %v673_v51  ;;  %v802_v13 = vshrl.u32 %v801_v9, 30  ;;  %vm697_vm1 = vcmp.eq.s32.totalorder %v2576_v16, 2  ;;  %vm694_vm3 = vcmp.eq.s32.totalorder %v2576_v16, 0 }
 0x12d   :  { %v872_v61 = vsub.s32 32, %v871_v30  ;;  %v874_v18 = vshll.u32 %v2047_v1, %v871_v30  ;;  %v877_v24 = vshll.u32 %v2048_v4, %v871_v30  ;;  %v880_v60 = vshll.u32 %v2049_v6, %v871_v30 }
 0x12e   :  { %v676_v45 = vmul.f32 -0.001358992, %v675_v58  ;;  %v683_v15 = vmul.f32 -0.00019511016, %v675_v58  ;;  %v803_v59 = vshll.u32 %v802_v13, 30  ;;  %v826_v53 = vsub.s32 4, %v802_v13 }
 0x12f   :  { %v875_v0 = vshrl.u32 %v2048_v4, %v872_v61  ;;  %v878_v41 = vshrl.u32 %v2049_v6, %v872_v61  ;;  %v881_v62 = vshrl.u32 %v2050_v11, %v872_v61  ;;  %v884_v7 = vshrl.u32 %v2051_v14, %v872_v61 }
 0x130   :  { %v677_v57 = vadd.f32 0.041655596, %v676_v45  ;;  %v684_v21 = vadd.f32 0.008332121, %v683_v15  ;;  %v2596_v20 = vsub.s32 %v800_v40, %v803_v59  ;;  %v827_v42 = vsel %vm704_vm15, %v826_v53, %v802_v13 }
 0x131   :  { %v883_v36 = vshll.u32 %v2050_v11, %v871_v30  ;;  %v876_v33 = vor.u32 %v875_v0, %v874_v18  ;;  %v886_v34 = vshll.u32 %v2051_v14, %v871_v30  ;;  %v887_v43 = vshrl.u32 %v2052_v17, %v872_v61 }
 0x132   :  { %v678_v5 = vmul.f32 %v677_v57, %v675_v58  ;;  %v685_v37 = vmul.f32 %v684_v21, %v675_v58  ;;  %vm805_vm2 = vcmp.lt.s32.totalorder %v2596_v20, 0  ;;  %v806_v35 = vsub.s32 0, %v2596_v20 }
 0x133   :  { %vm693_vm4 = vcmp.lt.s32.totalorder %v2576_v16, 2  ;;  %v2616_v32 = vor.u32 %v878_v41, %v877_v24  ;;  %vm690_vm5 = vweird.f32 %v2111_v46  ;;  %v882_v9 = vor.u32 %v881_v62, %v880_v60 }
 0x134   :  { %v679_v44 = vadd.f32 -0.4999988, %v678_v5  ;;  %v686_v3 = vadd.f32 -0.16666654, %v685_v37  ;;  %v807_v8 = vsel %vm805_vm2, %v806_v35, %v2596_v20  ;;  %v885_v39 = vor.u32 %v884_v7, %v883_v36 }
 0x135   :  { %v808_v23 = vclz %v807_v8  ;;  %v888_v13 = vor.u32 %v887_v43, %v886_v34  ;;  %v2619_v45 = vadd.s32 1, %v1990_v22  ;;  %v873_v30 = vshrl.u32 %v2047_v1, %v872_v61 }
 0x136   :  { %v680_v38 = vmul.f32 %v679_v44, %v675_v58  ;;  %v687_v40 = vmul.f32 %v686_v3, %v675_v58  ;;  %v829_v58 = vsel %vm2590_vm0, 0, %v827_v42  ;;  %vm889_vm6 = vcmp.lt.s32.totalorder %v2594_v56, 1 }
 0x137   :  { %v1985_v57 = vadd.s32 4294967294, %v808_v23  ;;  %vm890_vm7 = vcmp.lt.s32.totalorder %v2594_v56, 2  ;;  %vm892_vm8 = vcmp.lt.s32.totalorder %v2594_v56, 4  ;;  %v897_v22 = vsel %vm889_vm6, %v876_v33, %v2616_v32 }
 0x138   :  { %v681_v15 = vadd.f32 1.0, %v680_v38  ;;  %v688_v59 = vadd.f32 1.0, %v687_v40  ;;  %v898_v61 = vsel %vm892_vm8, %v885_v39, 920167782  ;;  %v901_v0 = vsel %vm889_vm6, %v2616_v32, %v882_v9 }
 0x139   :  { %vm1986_vm9 = vcmp.lt.s32.totalorder %v1985_v57, 0  ;;  %v902_v24 = vsel %vm892_vm8, %v888_v13, 1326507024  ;;  %vm891_vm10 = vcmp.lt.s32.totalorder %v2594_v56, 3  ;;  %vm1023_vm12 = vcmp.gt.s32.totalorder %v2619_v45, 0 }
 0x13a   :  { %v689_v21 = vmul.f32 %v688_v59, %v673_v51  ;;  %v698_v53 = vxor.u32 2147483648, %v681_v15  ;;  %v811_v18 = vsel %vm1986_vm9, 0, %v1985_v57  ;;  %v899_v35 = vsel %vm891_vm10, %v882_v9, %v898_v61 }
 0x13b   :  { %v812_v37 = vsub.s32 32, %v811_v18  ;;  %v813_v41 = vshll.u32 %v2596_v20, %v811_v18  ;;  %v816_v60 = vsub.s32 4294967266, %v811_v18  ;;  %v903_v62 = vsel %vm891_vm10, %v885_v39, %v902_v24 }
 0x13c   :  { %v695_v5 = vxor.u32 2147483648, %v689_v21  ;;  %v699_v51 = vsel %vm697_vm1, %v698_v53, %v689_v21  ;;  %v900_v3 = vsel %vm890_vm7, %v897_v22, %v899_v35  ;;  %v904_v42 = vsel %vm890_vm7, %v901_v0, %v903_v62 }
 0x13d   :  { %v814_v44 = vshrl.u32 %v2579_v54, %v812_v37  ;;  %v817_v36 = vadd.s32 127, %v816_v60  ;;  %v908_v8 = vand.u32 65535, %v904_v42  ;;  %v909_v34 = vshrl.u32 %v904_v42, 16 }
 0x13e   :  { %v696_v7 = vsel %vm694_vm3, %v681_v15, %v695_v5  ;;  %v930_v40 = vand.u32 65535, %v900_v3  ;;  %v931_v23 = vshrl.u32 %v900_v3, 16  ;;  %v2659_v15 = vadd.s32 3, %v829_v58 }
 0x13f   :  { %v700_v20 = vsel %vm693_vm4, %v696_v7, %v699_v51  ;;  %v815_v38 = vor.u32 %v814_v44, %v813_v41  ;;  %v818_v39 = vshll.u32 %v817_v36, 23  ;;  %v911_v54 = vmul.u32 %v909_v34, %v2582_v31 }
 0x140   :  { %v701_v43 = vsel %vm690_vm5, nan, %v700_v20  ;;  %v912_v13 = vmul.u32 %v908_v8, %v2585_v52  ;;  %v893_v16 = vsel %vm889_vm6, %v873_v30, %v876_v33  ;;  %v894_v46 = vsel %vm892_vm8, %v882_v9, 2102212464 }
 0x141   :  { %1945 = vst [vmem:[#allocation2 + $0x18] sm:$0xf] %v701_v43  ;;  %v933_v59 = vmul.u32 %v931_v23, %v2582_v31  ;;  %v819_v57 = vor.u32 4788187, %v818_v39  ;;  %v822_v21 = vcvt.s32.f32 %v815_v38  ;;  %v910_v53 = vmul.u32 %v908_v8, %v2582_v31 }
 0x142   :  { %v914_v22 = vshll.u32 %v911_v54, 16  ;;  %v913_v18 = vmul.u32 %v909_v34, %v2585_v52  ;;  %v932_v61 = vmul.u32 %v930_v40, %v2582_v31  ;;  %v934_v58 = vmul.u32 %v930_v40, %v2585_v52 }
 0x143   :  { %v936_v0 = vshll.u32 %v933_v59, 16  ;;  %v820_v24 = vand.u32 2147483647, %v819_v57  ;;  %v916_v5 = vshll.u32 %v912_v13, 16  ;;  %v895_v9 = vsel %vm891_vm10, %v2616_v32, %v894_v46 }
 0x144   :  { %vm918_vm11 = vc.u32 %v910_v53, %v914_v22  ;;  %v920_v33 = vadd.s32 %v914_v22, %v910_v53  ;;  %v935_v51 = vmul.u32 %v931_v23, %v2585_v52  ;;  %v938_v35 = vshll.u32 %v934_v58, 16 }
 0x145   :  { %v919_v30 = vsel %vm918_vm11, 1, %v2046_v2  ;;  %vm940_vm13 = vc.u32 %v932_v61, %v936_v0  ;;  %v823_v37 = vmul.f32 %v822_v21, %v820_v24  ;;  %v942_v62 = vadd.s32 %v936_v0, %v932_v61 }
 0x146   :  { %v921_v41 = vadd.s32 %v919_v30, %v913_v18  ;;  %vm922_vm14 = vc.u32 %v920_v33, %v916_v5  ;;  %v941_v31 = vsel %vm940_vm13, 1, %v2046_v2  ;;  %v915_v3 = vshrl.u32 %v911_v54, 16 }
 0x147   :  { %v923_v60 = vsel %vm922_vm14, 1, %v2046_v2  ;;  %v943_v7 = vadd.s32 %v941_v31, %v935_v51  ;;  %v824_v44 = vxor.u32 2147483648, %v823_v37  ;;  %v1024_v32 = vsel %vm1023_vm12, %v2619_v45, 0 }
 0x148   :  { %v925_v42 = vadd.s32 %v923_v60, %v921_v41  ;;  %v896_v52 = vsel %vm890_vm7, %v893_v16, %v895_v9  ;;  %v917_v20 = vshrl.u32 %v912_v13, 16  ;;  %vm944_vm1 = vc.u32 %v942_v62, %v938_v35 }
 0x149   :  { %v1026_v36 = vand.u32 31, %v1024_v32  ;;  %v825_v8 = vsel %vm704_vm15, %v824_v44, %v823_v37  ;;  %v937_v43 = vshrl.u32 %v933_v59, 16  ;;  %v945_v38 = vsel %vm944_vm1, 1, %v2046_v2 }
 0x14a   :  { %v926_v34 = vadd.s32 %v925_v42, %v915_v3  ;;  %v828_v40 = vsel %vm2590_vm0, %v2095_v25, %v825_v8  ;;  %v939_v23 = vshrl.u32 %v934_v58, 16  ;;  %v947_v39 = vadd.s32 %v945_v38, %v943_v7 }
 0x14b   :  { %v2688_v45 = vsub.s32 32, %v1026_v36  ;;  %v830_v56 = vmul.f32 %v828_v40, %v828_v40  ;;  %v2692_v13 = vadd.s32 %v942_v62, %v938_v35  ;;  %v2694_v16 = vshrl.u32 %v1024_v32, 5 }
 0x14c   :  { %v2690_v54 = vadd.s32 %v926_v34, %v917_v20  ;;  %v948_v46 = vadd.s32 %v947_v39, %v937_v43  ;;  %v1029_v59 = vshll.u32 %v2047_v1, %v1026_v36  ;;  %v1032_v22 = vshll.u32 %v2048_v4, %v1026_v36 }
 0x14d   :  { %v1030_v57 = vshrl.u32 %v2048_v4, %v2688_v45  ;;  %v1033_v19 = vshrl.u32 %v2049_v6, %v2688_v45  ;;  %v831_v21 = vmul.f32 -0.001358992, %v830_v56  ;;  %v838_v53 = vmul.f32 -0.00019511016, %v830_v56 }
 0x14e   :  { %v1035_v18 = vshll.u32 %v2049_v6, %v1026_v36  ;;  %v949_v61 = vadd.s32 %v948_v46, %v939_v23  ;;  %vm952_vm15 = vc.u32 %v2690_v54, %v2692_v13  ;;  %v1036_v0 = vshrl.u32 %v2050_v11, %v2688_v45 }
 0x14f   :  { %v2705_v58 = vor.u32 %v1030_v57, %v1029_v59  ;;  %v832_v24 = vadd.f32 0.041655596, %v831_v21  ;;  %v839_v5 = vadd.f32 0.008332121, %v838_v53  ;;  %v1038_v33 = vshll.u32 %v2050_v11, %v1026_v36 }
 0x150   :  { %v1039_v9 = vshrl.u32 %v2051_v14, %v2688_v45  ;;  %v953_v30 = vadd.s32 1, %v949_v61  ;;  %v2712_v51 = vor.u32 %v1033_v19, %v1032_v22  ;;  %v1041_v37 = vshll.u32 %v2051_v14, %v1026_v36 }
 0x151   :  { %v1042_v41 = vshrl.u32 %v2052_v17, %v2688_v45  ;;  %v833_v31 = vmul.f32 %v832_v24, %v830_v56  ;;  %v840_v60 = vmul.f32 %v839_v5, %v830_v56  ;;  %v950_v35 = vmul.u32 %v2567_v27, %v896_v52 }
 0x152   :  { %v1040_v62 = vor.u32 %v1039_v9, %v1038_v33  ;;  %v954_v7 = vsel %vm952_vm15, %v953_v30, %v949_v61  ;;  %v1037_v44 = vor.u32 %v1036_v0, %v1035_v18  ;;  %vm1044_vm0 = vcmp.lt.s32.totalorder %v2694_v16, 1 }
 0x153   :  { %v1043_v3 = vor.u32 %v1042_v41, %v1041_v37  ;;  %v834_v42 = vadd.f32 -0.4999988, %v833_v31  ;;  %v841_v32 = vadd.f32 -0.16666654, %v840_v60  ;;  %v955_v20 = vadd.s32 %v954_v7, %v950_v35 }
 0x154   :  { %vm1047_vm2 = vcmp.lt.s32.totalorder %v2694_v16, 4  ;;  %v847_v36 = vand.u32 3, %v2659_v15  ;;  %v1052_v8 = vsel %vm1044_vm0, %v2705_v58, %v2712_v51  ;;  %v2729_v52 = vshll.u32 %v1020_v12, 8 }
 0x155   :  { %v1053_v27 = vsel %vm1047_vm2, %v1040_v62, 920167782  ;;  %v835_v34 = vmul.f32 %v834_v42, %v830_v56  ;;  %v842_v43 = vmul.f32 %v841_v32, %v830_v56  ;;  %v956_v38 = vadd.s32 536870912, %v955_v20 }
 0x156   :  { %vm1046_vm3 = vcmp.lt.s32.totalorder %v2694_v16, 3  ;;  %vm1045_vm4 = vcmp.lt.s32.totalorder %v2694_v16, 2  ;;  %v1056_v23 = vsel %vm1044_vm0, %v2712_v51, %v1037_v44  ;;  %v1057_v39 = vsel %vm1047_vm2, %v1043_v3, 1326507024 }
 0x157   :  { %v1054_v15 = vsel %vm1046_vm3, %v1037_v44, %v1053_v27  ;;  %v836_v63 = vadd.f32 1.0, %v835_v34  ;;  %v843_v12 = vadd.f32 1.0, %v842_v43  ;;  %v2740_v46 = vshrl.u32 %v956_v38, 30 }
 0x158   :  { %v1055_v56 = vsel %vm1045_vm4, %v1052_v8, %v1054_v15  ;;  %vm845_vm5 = vweird.f32 %v2095_v25  ;;  %v1058_v59 = vsel %vm1046_vm3, %v1040_v62, %v1057_v39  ;;  %vm848_vm6 = vcmp.lt.s32.totalorder %v847_v36, 2 }
 0x159   :  { %v844_v57 = vmul.f32 %v843_v12, %v828_v40  ;;  %v853_v19 = vxor.u32 2147483648, %v836_v63  ;;  %v958_v21 = vshll.u32 %v2740_v46, 30  ;;  %vm849_vm7 = vcmp.eq.s32.totalorder %v847_v36, 0 }
 0x15a   :  { %vm852_vm8 = vcmp.eq.s32.totalorder %v847_v36, 2  ;;  %v1059_v53 = vsel %vm1045_vm4, %v1056_v23, %v1058_v59  ;;  %v1086_v22 = vshrl.u32 %v1055_v56, 16  ;;  %v1061_v0 = vand.u32 65535, %v2729_v52 }
 0x15b   :  { %v850_v18 = vxor.u32 2147483648, %v844_v57  ;;  %v959_v61 = vsub.s32 %v955_v20, %v958_v21  ;;  %v1085_v24 = vand.u32 65535, %v1055_v56  ;;  %v1028_v5 = vshrl.u32 %v2047_v1, %v2688_v45 }
 0x15c   :  { %v1062_v40 = vshrl.u32 %v2729_v52, 16  ;;  %v1063_v33 = vand.u32 65535, %v1059_v53  ;;  %v1064_v9 = vshrl.u32 %v1059_v53, 16  ;;  %v854_v37 = vsel %vm852_vm8, %v853_v19, %v844_v57 }
 0x15d   :  { %v851_v30 = vsel %vm849_vm7, %v836_v63, %v850_v18  ;;  %vm960_vm9 = vcmp.lt.s32.totalorder %v959_v61, 0  ;;  %v961_v41 = vsub.s32 0, %v959_v61  ;;  %v1088_v62 = vmul.u32 %v1086_v22, %v1061_v0 }
 0x15e   :  { %v855_v31 = vsel %vm848_vm6, %v851_v30, %v854_v37  ;;  %v1066_v60 = vmul.u32 %v1064_v9, %v1061_v0  ;;  %v1067_v35 = vmul.u32 %v1063_v33, %v1062_v40  ;;  %v951_v3 = vadd.s32 %v2692_v13, %v2690_v54 }
 0x15f   :  { %v856_v7 = vsel %vm845_vm5, nan, %v855_v31  ;;  %v962_v45 = vsel %vm960_vm9, %v961_v41, %v959_v61  ;;  %v1089_v42 = vmul.u32 %v1085_v24, %v1062_v40  ;;  %v1049_v20 = vsel %vm1047_vm2, %v1037_v44, 2102212464 }
 0x160   :  { %v963_v32 = vclz %v962_v45  ;;  %v1065_v8 = vmul.u32 %v1063_v33, %v1061_v0  ;;  %v1069_v27 = vshll.u32 %v1066_v60, 16  ;;  %1946 = vst [vmem:[#allocation2 + $0x20] sm:$0xff] %v856_v7  ;;  %v1048_v36 = vsel %vm1044_vm0, %v1028_v5, %v2705_v58 }
 0x161   :  { %v1068_v34 = vmul.u32 %v1064_v9, %v1062_v40  ;;  %v1071_v43 = vshll.u32 %v1067_v35, 16  ;;  %v1087_v25 = vmul.u32 %v1085_v24, %v1061_v0  ;;  %v1091_v54 = vshll.u32 %v1088_v62, 16 }
 0x162   :  { %v1988_v38 = vadd.s32 4294967294, %v963_v32  ;;  %vm1073_vm10 = vc.u32 %v1065_v8, %v1069_v27  ;;  %v1075_v15 = vadd.s32 %v1069_v27, %v1065_v8  ;;  %v1050_v13 = vsel %vm1046_vm3, %v2712_v51, %v1049_v20 }
 0x163   :  { %v1074_v44 = vsel %vm1073_vm10, 1, %v2046_v2  ;;  %v1090_v23 = vmul.u32 %v1086_v22, %v1062_v40  ;;  %v1093_v39 = vshll.u32 %v1089_v42, 16  ;;  %vm1095_vm13 = vc.u32 %v1087_v25, %v1091_v54 }
 0x164   :  { %vm1989_vm12 = vcmp.lt.s32.totalorder %v1988_v38, 0  ;;  %v1076_v63 = vadd.s32 %v1074_v44, %v1068_v34  ;;  %vm1077_vm11 = vc.u32 %v1075_v15, %v1071_v43  ;;  %v1096_v56 = vsel %vm1095_vm13, 1, %v2046_v2 }
 0x165   :  { %v966_v58 = vsel %vm1989_vm12, 0, %v1988_v38  ;;  %v1078_v12 = vsel %vm1077_vm11, 1, %v2046_v2  ;;  %v1097_v59 = vadd.s32 %v1091_v54, %v1087_v25  ;;  %v1070_v21 = vshrl.u32 %v1066_v60, 16 }
 0x166   :  { %v967_v57 = vsub.s32 32, %v966_v58  ;;  %v971_v19 = vsub.s32 4294967266, %v966_v58  ;;  %v1080_v53 = vadd.s32 %v1078_v12, %v1076_v63  ;;  %v968_v18 = vshll.u32 %v959_v61, %v966_v58 }
 0x167   :  { %v1072_v51 = vshrl.u32 %v1067_v35, 16  ;;  %v1098_v0 = vadd.s32 %v1096_v56, %v1090_v23  ;;  %vm1099_vm14 = vc.u32 %v1097_v59, %v1093_v39  ;;  %v981_v33 = vsub.s32 4, %v2740_v46 }
 0x168   :  { %v969_v22 = vshrl.u32 %v951_v3, %v967_v57  ;;  %v972_v24 = vadd.s32 127, %v971_v19  ;;  %v1081_v5 = vadd.s32 %v1080_v53, %v1070_v21  ;;  %v1100_v40 = vsel %vm1099_vm14, 1, %v2046_v2 }
 0x169   :  { %v1092_v9 = vshrl.u32 %v1088_v62, 16  ;;  %v1102_v30 = vadd.s32 %v1100_v40, %v1098_v0  ;;  %v1167_v37 = vand.u32 2147483647, %v2115_v48  ;;  %v1170_v60 = vand.u32 2139095040, %v2115_v48 }
 0x16a   :  { %v970_v41 = vor.u32 %v969_v22, %v968_v18  ;;  %v973_v31 = vshll.u32 %v972_v24, 23  ;;  %v1082_v7 = vadd.s32 %v1081_v5, %v1072_v51  ;;  %v1094_v61 = vshrl.u32 %v1089_v42, 16 }
 0x16b   :  { %v1103_v35 = vadd.s32 %v1102_v30, %v1092_v9  ;;  %vm859_vm1 = vcmp.lt.s32.totalorder %v2113_v47, 0  ;;  %v1051_v45 = vsel %vm1045_vm4, %v1048_v36, %v1050_v13  ;;  %v1101_v32 = vadd.s32 %v1097_v59, %v1093_v39 }
 0x16c   :  { %v974_v3 = vor.u32 4788187, %v973_v31  ;;  %v982_v62 = vsel %vm859_vm1, %v981_v33, %v2740_v46  ;;  %v1171_v8 = vshrl.u32 %v1170_v60, 23  ;;  %v1174_v27 = vand.u32 8388607, %v1167_v37 }
 0x16d   :  { %v1104_v20 = vadd.s32 %v1103_v35, %v1094_v61  ;;  %v977_v43 = vcvt.s32.f32 %v970_v41  ;;  %vm1107_vm15 = vc.u32 %v1082_v7, %v1101_v32  ;;  %v1325_v42 = vand.u32 2139095040, %v2099_v28 }
 0x16e   :  { %v975_v34 = vand.u32 2147483647, %v974_v3  ;;  %vm2785_vm0 = vcmp.le.f32.partialorder %v857_v10, 0.7853982  ;;  %v1993_v25 = vadd.s32 4294967169, %v1171_v8  ;;  %v1105_v15 = vmul.u32 %v2729_v52, %v1051_v45 }
 0x16f   :  { %v1108_v36 = vadd.s32 1, %v1104_v20  ;;  %v984_v46 = vsel %vm2785_vm0, 0, %v982_v62  ;;  %v1175_v13 = vor.u32 8388608, %v1174_v27  ;;  %v1322_v23 = vand.u32 2147483647, %v2099_v28 }
 0x170   :  { %v978_v38 = vmul.f32 %v977_v43, %v975_v34  ;;  %v1177_v44 = vadd.s32 1, %v1993_v25  ;;  %v1326_v58 = vshrl.u32 %v1325_v42, 23  ;;  %v1001_v10 = vadd.s32 3, %v984_v46 }
 0x171   :  { %v1109_v54 = vsel %vm1107_vm15, %v1108_v36, %v1104_v20  ;;  %v2800_v19 = vshll.u32 %v1175_v13, 8  ;;  %v2804_v21 = vand.u32 8388607, %v1322_v23  ;;  %vm2812_vm3 = vcmp.le.f32.partialorder %v1012_v55, 0.7853982 }
 0x172   :  { %v979_v39 = vxor.u32 2147483648, %v978_v38  ;;  %v1110_v63 = vadd.s32 %v1109_v54, %v1105_v15  ;;  %vm1178_vm2 = vcmp.gt.s32.totalorder %v1177_v44, 0  ;;  %v1996_v51 = vadd.s32 4294967169, %v1326_v58 }
 0x173   :  { %v1179_v59 = vsel %vm1178_vm2, %v1177_v44, 0  ;;  %v2808_v0 = vand.u32 3, %v1001_v10  ;;  %vm1014_vm4 = vcmp.lt.s32.totalorder %v2097_v26, 0  ;;  %v1106_v30 = vadd.s32 %v1101_v32, %v1082_v7 }
 0x174   :  { %v980_v12 = vsel %vm859_vm1, %v979_v39, %v978_v38  ;;  %v1111_v56 = vadd.s32 536870912, %v1110_v63  ;;  %v1181_v52 = vand.u32 31, %v1179_v59  ;;  %v2818_v41 = vand.u32 65535, %v2800_v19 }
 0x175   :  { %v2798_v57 = vsel %vm2785_vm0, %v2113_v47, %v980_v12  ;;  %v2821_v31 = vshrl.u32 %v2800_v19, 16  ;;  %v1330_v60 = vor.u32 8388608, %v2804_v21  ;;  %v2826_v3 = vadd.s32 1, %v1996_v51 }
 0x176   :  { %v985_v53 = vmul.f32 %v2798_v57, %v2798_v57  ;;  %v1112_v18 = vshrl.u32 %v1111_v56, 30  ;;  %v1182_v24 = vsub.s32 32, %v1181_v52  ;;  %v2832_v62 = vshrl.u32 %v1179_v59, 5 }
 0x177   :  { %v1184_v7 = vshll.u32 %v2047_v1, %v1181_v52  ;;  %v1187_v34 = vshll.u32 %v2048_v4, %v1181_v52  ;;  %v1190_v42 = vshll.u32 %v2049_v6, %v1181_v52  ;;  %vm1004_vm6 = vcmp.eq.s32.totalorder %v2808_v0, 0 }
 0x178   :  { %v986_v5 = vmul.f32 -0.001358992, %v985_v53  ;;  %v993_v40 = vmul.f32 -0.00019511016, %v985_v53  ;;  %v1113_v33 = vshll.u32 %v1112_v18, 30  ;;  %v1136_v9 = vsub.s32 4, %v1112_v18 }
 0x179   :  { %v1185_v32 = vshrl.u32 %v2048_v4, %v1182_v24  ;;  %v1188_v43 = vshrl.u32 %v2049_v6, %v1182_v24  ;;  %v1191_v16 = vshrl.u32 %v2050_v11, %v1182_v24  ;;  %v1194_v46 = vshrl.u32 %v2051_v14, %v1182_v24 }
 0x17a   :  { %v987_v55 = vadd.f32 0.041655596, %v986_v5  ;;  %v994_v61 = vadd.f32 0.008332121, %v993_v40  ;;  %v2824_v35 = vsub.s32 %v1110_v63, %v1113_v33  ;;  %v2830_v45 = vsel %vm1014_vm4, %v1136_v9, %v1112_v18 }
 0x17b   :  { %vm1007_vm7 = vcmp.eq.s32.totalorder %v2808_v0, 2  ;;  %v1139_v54 = vsel %vm2812_vm3, 0, %v2830_v45  ;;  %v1183_v13 = vshrl.u32 %v2047_v1, %v1182_v24  ;;  %v1197_v44 = vshrl.u32 %v2052_v17, %v1182_v24 }
 0x17c   :  { %v988_v20 = vmul.f32 %v987_v55, %v985_v53  ;;  %v995_v8 = vmul.f32 %v994_v61, %v985_v53  ;;  %vm1115_vm5 = vcmp.lt.s32.totalorder %v2824_v35, 0  ;;  %v1116_v27 = vsub.s32 0, %v2824_v35 }
 0x17d   :  { %vm1003_vm8 = vcmp.lt.s32.totalorder %v2808_v0, 2  ;;  %v1186_v58 = vor.u32 %v1185_v32, %v1184_v7  ;;  %v1193_v10 = vshll.u32 %v2050_v11, %v1181_v52  ;;  %vm1000_vm9 = vweird.f32 %v2113_v47 }
 0x17e   :  { %v989_v36 = vadd.f32 -0.4999988, %v988_v20  ;;  %v996_v25 = vadd.f32 -0.16666654, %v995_v8  ;;  %v1117_v38 = vsel %vm1115_vm5, %v1116_v27, %v2824_v35  ;;  %v1189_v56 = vor.u32 %v1188_v43, %v1187_v34 }
 0x17f   :  { %v1118_v15 = vclz %v1117_v38  ;;  %v1192_v59 = vor.u32 %v1191_v16, %v1190_v42  ;;  %v1196_v18 = vshll.u32 %v2051_v14, %v1181_v52  ;;  %v1195_v40 = vor.u32 %v1194_v46, %v1193_v10 }
 0x180   :  { %v990_v39 = vmul.f32 %v989_v36, %v985_v53  ;;  %v997_v63 = vmul.f32 %v996_v25, %v985_v53  ;;  %vm1199_vm10 = vcmp.lt.s32.totalorder %v2832_v62, 1  ;;  %vm1200_vm11 = vcmp.lt.s32.totalorder %v2832_v62, 2 }
 0x181   :  { %v1991_v12 = vadd.s32 4294967294, %v1118_v15  ;;  %v1198_v24 = vor.u32 %v1197_v44, %v1196_v18  ;;  %vm1201_vm13 = vcmp.lt.s32.totalorder %v2832_v62, 3  ;;  %vm1202_vm14 = vcmp.lt.s32.totalorder %v2832_v62, 4 }
 0x182   :  { %v991_v51 = vadd.f32 1.0, %v990_v39  ;;  %v998_v5 = vadd.f32 1.0, %v997_v63  ;;  %v1204_v52 = vsel %vm1202_vm14, %v1192_v59, 2102212464  ;;  %v1207_v45 = vsel %vm1199_vm10, %v1186_v58, %v1189_v56 }
 0x183   :  { %vm1992_vm12 = vcmp.lt.s32.totalorder %v1991_v12, 0  ;;  %v1208_v20 = vsel %vm1202_vm14, %v1195_v40, 920167782  ;;  %v1211_v8 = vsel %vm1199_vm10, %v1189_v56, %v1192_v59  ;;  %v1212_v43 = vsel %vm1202_vm14, %v1198_v24, 1326507024 }
 0x184   :  { %v999_v53 = vmul.f32 %v998_v5, %v2798_v57  ;;  %v1008_v33 = vxor.u32 2147483648, %v991_v51  ;;  %v1121_v9 = vsel %vm1992_vm12, 0, %v1991_v12  ;;  %v1209_v57 = vsel %vm1201_vm13, %v1192_v59, %v1208_v20 }
 0x185   :  { %v1122_v55 = vsub.s32 32, %v1121_v9  ;;  %v1126_v61 = vsub.s32 4294967266, %v1121_v9  ;;  %v1123_v32 = vshll.u32 %v2824_v35, %v1121_v9  ;;  %v1210_v36 = vsel %vm1200_vm11, %v1207_v45, %v1209_v57 }
 0x186   :  { %v1005_v7 = vxor.u32 2147483648, %v999_v53  ;;  %v1009_v16 = vsel %vm1007_vm7, %v1008_v33, %v999_v53  ;;  %v1213_v35 = vsel %vm1201_vm13, %v1195_v40, %v1212_v43  ;;  %v1240_v63 = vand.u32 65535, %v1210_v36 }
 0x187   :  { %v1124_v27 = vshrl.u32 %v1106_v30, %v1122_v55  ;;  %v1127_v34 = vadd.s32 127, %v1126_v61  ;;  %v1214_v46 = vsel %vm1200_vm11, %v1211_v8, %v1213_v35  ;;  %v1203_v12 = vsel %vm1199_vm10, %v1183_v13, %v1186_v58 }
 0x188   :  { %v1006_v42 = vsel %vm1004_vm6, %v991_v51, %v1005_v7  ;;  %v1218_v44 = vand.u32 65535, %v1214_v46  ;;  %v1219_v39 = vshrl.u32 %v1214_v46, 16  ;;  %v1205_v59 = vsel %vm1201_vm13, %v1189_v56, %v1204_v52 }
 0x189   :  { %v1010_v30 = vsel %vm1003_vm8, %v1006_v42, %v1009_v16  ;;  %v1125_v25 = vor.u32 %v1124_v27, %v1123_v32  ;;  %v1128_v38 = vshll.u32 %v1127_v34, 23  ;;  %v1241_v0 = vshrl.u32 %v1210_v36, 16 }
 0x18a   :  { %v1011_v15 = vsel %vm1000_vm9, nan, %v1010_v30  ;;  %v2885_v18 = vadd.s32 3, %v1139_v54  ;;  %v1221_v51 = vmul.u32 %v1219_v39, %v2818_v41  ;;  %v1222_v5 = vmul.u32 %v1218_v44, %v2821_v31 }
 0x18b   :  { %v1129_v10 = vor.u32 4788187, %v1128_v38  ;;  %1947 = vst [vmem:[#allocation2 + $0x28] sm:$0xf] %v1011_v15  ;;  %vm1333_vm1 = vcmp.gt.s32.totalorder %v2826_v3, 0  ;;  %v1132_v40 = vcvt.s32.f32 %v1125_v25  ;;  %v1243_v24 = vmul.u32 %v1241_v0, %v2818_v41 }
 0x18c   :  { %v1244_v53 = vmul.u32 %v1240_v63, %v2821_v31  ;;  %v2894_v13 = vsel %vm1200_vm11, %v1203_v12, %v1205_v59  ;;  %v1220_v58 = vmul.u32 %v1218_v44, %v2818_v41  ;;  %v1223_v54 = vmul.u32 %v1219_v39, %v2821_v31 }
 0x18d   :  { %v1130_v47 = vand.u32 2147483647, %v1129_v10  ;;  %v1224_v56 = vshll.u32 %v1221_v51, 16  ;;  %v1226_v9 = vshll.u32 %v1222_v5, 16  ;;  %v1242_v55 = vmul.u32 %v1240_v63, %v2818_v41 }
 0x18e   :  { %v1246_v61 = vshll.u32 %v1243_v24, 16  ;;  %v1245_v45 = vmul.u32 %v1241_v0, %v2821_v31  ;;  %v1248_v7 = vshll.u32 %v1244_v53, 16  ;;  %v1334_v34 = vsel %vm1333_vm1, %v2826_v3, 0 }
 0x18f   :  { %v1133_v33 = vmul.f32 %v1132_v40, %v1130_v47  ;;  %vm1228_vm15 = vc.u32 %v1220_v58, %v1224_v56  ;;  %v1230_v52 = vadd.s32 %v1224_v56, %v1220_v58  ;;  %v1225_v42 = vshrl.u32 %v1221_v51, 16 }
 0x190   :  { %v1229_v62 = vsel %vm1228_vm15, 1, %v2046_v2  ;;  %vm1250_vm0 = vc.u32 %v1242_v55, %v1246_v61  ;;  %v1252_v20 = vadd.s32 %v1246_v61, %v1242_v55  ;;  %v1247_v30 = vshrl.u32 %v1243_v24, 16 }
 0x191   :  { %v1134_v32 = vxor.u32 2147483648, %v1133_v33  ;;  %v1231_v8 = vadd.s32 %v1229_v62, %v1223_v54  ;;  %vm1232_vm2 = vc.u32 %v1230_v52, %v1226_v9  ;;  %v1251_v27 = vsel %vm1250_vm0, 1, %v2046_v2 }
 0x192   :  { %v1233_v57 = vsel %vm1232_vm2, 1, %v2046_v2  ;;  %v1253_v31 = vadd.s32 %v1251_v27, %v1245_v45  ;;  %vm1254_vm5 = vc.u32 %v1252_v20, %v1248_v7  ;;  %v1336_v38 = vand.u32 31, %v1334_v34 }
 0x193   :  { %v1135_v41 = vsel %vm1014_vm4, %v1134_v32, %v1133_v33  ;;  %v1235_v16 = vadd.s32 %v1233_v57, %v1231_v8  ;;  %v1255_v36 = vsel %vm1254_vm5, 1, %v2046_v2  ;;  %v1227_v3 = vshrl.u32 %v1222_v5, 16 }
 0x194   :  { %v1138_v43 = vsel %vm2812_vm3, %v2097_v26, %v1135_v41  ;;  %v1257_v25 = vadd.s32 %v1255_v36, %v1253_v31  ;;  %v1249_v15 = vshrl.u32 %v1244_v53, 16  ;;  %v1260_v44 = vmul.u32 %v2800_v19, %v2894_v13 }
 0x195   :  { %v1140_v35 = vmul.f32 %v1138_v43, %v1138_v43  ;;  %v1236_v46 = vadd.s32 %v1235_v16, %v1225_v42  ;;  %v2914_v12 = vsub.s32 32, %v1336_v38  ;;  %v2918_v59 = vadd.s32 %v1252_v20, %v1248_v7 }
 0x196   :  { %v1258_v10 = vadd.s32 %v1257_v25, %v1247_v30  ;;  %v2920_v0 = vshrl.u32 %v1334_v34, 5  ;;  %v1339_v51 = vshll.u32 %v2047_v1, %v1336_v38  ;;  %v1342_v24 = vshll.u32 %v2048_v4, %v1336_v38 }
 0x197   :  { %v1141_v39 = vmul.f32 -0.001358992, %v1140_v35  ;;  %v1148_v63 = vmul.f32 -0.00019511016, %v1140_v35  ;;  %v2916_v22 = vadd.s32 %v1236_v46, %v1227_v3  ;;  %v1340_v19 = vshrl.u32 %v2048_v4, %v2914_v12 }
 0x198   :  { %v1259_v40 = vadd.s32 %v1258_v10, %v1249_v15  ;;  %v1343_v53 = vshrl.u32 %v2049_v6, %v2914_v12  ;;  %v1345_v13 = vshll.u32 %v2049_v6, %v1336_v38  ;;  %v1346_v33 = vshrl.u32 %v2050_v11, %v2914_v12 }
 0x199   :  { %v1142_v47 = vadd.f32 0.041655596, %v1141_v39  ;;  %v1149_v5 = vadd.f32 0.008332121, %v1148_v63  ;;  %vm1262_vm3 = vc.u32 %v2916_v22, %v2918_v59  ;;  %v2933_v9 = vor.u32 %v1340_v19, %v1339_v51 }
 0x19a   :  { %v1263_v56 = vadd.s32 1, %v1259_v40  ;;  %v2935_v55 = vor.u32 %v1343_v53, %v1342_v24  ;;  %v1348_v61 = vshll.u32 %v2050_v11, %v1336_v38  ;;  %v1349_v52 = vshrl.u32 %v2051_v14, %v2914_v12 }
 0x19b   :  { %v1143_v58 = vmul.f32 %v1142_v47, %v1140_v35  ;;  %v1150_v54 = vmul.f32 %v1149_v5, %v1140_v35  ;;  %v2940_v62 = vor.u32 %v1346_v33, %v1345_v13  ;;  %v1351_v27 = vshll.u32 %v2051_v14, %v1336_v38 }
 0x19c   :  { %v1264_v32 = vsel %vm1262_vm3, %v1263_v56, %v1259_v40  ;;  %v1350_v8 = vor.u32 %v1349_v52, %v1348_v61  ;;  %v1352_v34 = vshrl.u32 %v2052_v17, %v2914_v12  ;;  %v1157_v31 = vand.u32 3, %v2885_v18 }
 0x19d   :  { %v1144_v45 = vadd.f32 -0.4999988, %v1143_v58  ;;  %v1151_v7 = vadd.f32 -0.16666654, %v1150_v54  ;;  %v1265_v20 = vadd.s32 %v1264_v32, %v1260_v44  ;;  %vm1354_vm4 = vcmp.lt.s32.totalorder %v2920_v0, 1 }
 0x19e   :  { %v1353_v16 = vor.u32 %v1352_v34, %v1351_v27  ;;  %vm1355_vm6 = vcmp.lt.s32.totalorder %v2920_v0, 2  ;;  %vm1357_vm7 = vcmp.lt.s32.totalorder %v2920_v0, 4  ;;  %vm1356_vm8 = vcmp.lt.s32.totalorder %v2920_v0, 3 }
 0x19f   :  { %v1145_v41 = vmul.f32 %v1144_v45, %v1140_v35  ;;  %v1152_v57 = vmul.f32 %v1151_v7, %v1140_v35  ;;  %v1266_v42 = vadd.s32 536870912, %v1265_v20  ;;  %v1363_v25 = vsel %vm1357_vm7, %v1350_v8, 920167782 }
 0x1a0   :  { %v1362_v18 = vsel %vm1354_vm4, %v2933_v9, %v2935_v55  ;;  %v1366_v35 = vsel %vm1354_vm4, %v2935_v55, %v2940_v62  ;;  %v1367_v3 = vsel %vm1357_vm7, %v1353_v16, 1326507024  ;;  %v1364_v44 = vsel %vm1356_vm8, %v2940_v62, %v1363_v25 }
 0x1a1   :  { %v1146_v36 = vadd.f32 1.0, %v1145_v41  ;;  %v1153_v30 = vadd.f32 1.0, %v1152_v57  ;;  %v2952_v38 = vshrl.u32 %v1266_v42, 30  ;;  %v1368_v39 = vsel %vm1356_vm8, %v1350_v8, %v1367_v3 }
 0x1a2   :  { %v1369_v10 = vsel %vm1355_vm6, %v1366_v35, %v1368_v39  ;;  %v2974_v51 = vshll.u32 %v1330_v60, 8  ;;  %vm1158_vm9 = vcmp.lt.s32.totalorder %v1157_v31, 2  ;;  %vm1159_vm10 = vcmp.eq.s32.totalorder %v1157_v31, 0 }
 0x1a3   :  { %v1154_v46 = vmul.f32 %v1153_v30, %v1138_v43  ;;  %v1163_v15 = vxor.u32 2147483648, %v1146_v36  ;;  %v1268_v63 = vshll.u32 %v2952_v38, 30  ;;  %v1373_v43 = vand.u32 65535, %v1369_v10 }
 0x1a4   :  { %v1374_v5 = vshrl.u32 %v1369_v10, 16  ;;  %vm1162_vm12 = vcmp.eq.s32.totalorder %v1157_v31, 2  ;;  %v1365_v24 = vsel %vm1355_vm6, %v1362_v18, %v1364_v44  ;;  %v1371_v13 = vand.u32 65535, %v2974_v51 }
 0x1a5   :  { %v1160_v47 = vxor.u32 2147483648, %v1154_v46  ;;  %v1269_v40 = vsub.s32 %v1265_v20, %v1268_v63  ;;  %v1164_v53 = vsel %vm1162_vm12, %v1163_v15, %v1154_v46  ;;  %v1372_v58 = vshrl.u32 %v2974_v51, 16 }
 0x1a6   :  { %vm1155_vm11 = vweird.f32 %v2097_v26  ;;  %v1376_v56 = vmul.u32 %v1374_v5, %v1371_v13  ;;  %v1396_v61 = vshrl.u32 %v1365_v24, 16  ;;  %v1395_v45 = vand.u32 65535, %v1365_v24 }
 0x1a7   :  { %v1161_v19 = vsel %vm1159_vm10, %v1146_v36, %v1160_v47  ;;  %vm1270_vm13 = vcmp.lt.s32.totalorder %v1269_v40, 0  ;;  %v1271_v60 = vsub.s32 0, %v1269_v40  ;;  %v1377_v33 = vmul.u32 %v1373_v43, %v1372_v58 }
 0x1a8   :  { %v1165_v21 = vsel %vm1158_vm9, %v1161_v19, %v1164_v53  ;;  %v1375_v32 = vmul.u32 %v1373_v43, %v1371_v13  ;;  %v1379_v20 = vshll.u32 %v1376_v56, 16  ;;  %v1338_v8 = vshrl.u32 %v2047_v1, %v2914_v12 }
 0x1a9   :  { %v1166_v54 = vsel %vm1155_vm11, nan, %v1165_v21  ;;  %v1272_v52 = vsel %vm1270_vm13, %v1271_v60, %v1269_v40  ;;  %v1378_v27 = vmul.u32 %v1374_v5, %v1372_v58  ;;  %v1381_v34 = vshll.u32 %v1377_v33, 16 }
 0x1aa   :  { %1948 = vst [vmem:[#allocation2 + $0x30] sm:$0xff] %v1166_v54  ;;  %v1273_v7 = vclz %v1272_v52  ;;  %vm1383_vm14 = vc.u32 %v1375_v32, %v1379_v20  ;;  %v1385_v26 = vadd.s32 %v1379_v20, %v1375_v32  ;;  %v1398_v57 = vmul.u32 %v1396_v61, %v1371_v13 }
 0x1ab   :  { %vm1169_vm1 = vcmp.lt.s32.totalorder %v2115_v48, 0  ;;  %v1261_v31 = vadd.s32 %v2918_v59, %v2916_v22  ;;  %v1291_v42 = vsub.s32 4, %v2952_v38  ;;  %v1384_v16 = vsel %vm1383_vm14, 1, %v2046_v2 }
 0x1ac   :  { %v1994_v41 = vadd.s32 4294967294, %v1273_v7  ;;  %v1399_v36 = vmul.u32 %v1395_v45, %v1372_v58  ;;  %v1386_v30 = vadd.s32 %v1384_v16, %v1378_v27  ;;  %vm1387_vm0 = vc.u32 %v1385_v26, %v1381_v34 }
 0x1ad   :  { %v1401_v12 = vshll.u32 %v1398_v57, 16  ;;  %v1380_v18 = vshrl.u32 %v1376_v56, 16  ;;  %v1388_v35 = vsel %vm1387_vm0, 1, %v2046_v2  ;;  %v1397_v3 = vmul.u32 %v1395_v45, %v1371_v13 }
 0x1ae   :  { %vm1995_vm15 = vcmp.lt.s32.totalorder %v1994_v41, 0  ;;  %v1390_v44 = vadd.s32 %v1388_v35, %v1386_v30  ;;  %v1400_v39 = vmul.u32 %v1396_v61, %v1372_v58  ;;  %v1403_v22 = vshll.u32 %v1399_v36, 16 }
 0x1af   :  { %v1276_v25 = vsel %vm1995_vm15, 0, %v1994_v41  ;;  %vm1405_vm2 = vc.u32 %v1397_v3, %v1401_v12  ;;  %v1407_v59 = vadd.s32 %v1401_v12, %v1397_v3  ;;  %v1359_v24 = vsel %vm1357_vm7, %v2940_v62, 2102212464 }
 0x1b0   :  { %v1277_v46 = vsub.s32 32, %v1276_v25  ;;  %v1281_v15 = vsub.s32 4294967266, %v1276_v25  ;;  %v1278_v63 = vshll.u32 %v1269_v40, %v1276_v25  ;;  %v1391_v43 = vadd.s32 %v1390_v44, %v1380_v18 }
 0x1b1   :  { %v1406_v5 = vsel %vm1405_vm2, 1, %v2046_v2  ;;  %vm1409_vm5 = vc.u32 %v1407_v59, %v1403_v22  ;;  %v1477_v53 = vand.u32 2147483647, %v2117_v49  ;;  %v1382_v58 = vshrl.u32 %v1377_v33, 16 }
 0x1b2   :  { %v1279_v10 = vshrl.u32 %v1261_v31, %v1277_v46  ;;  %v1282_v47 = vadd.s32 127, %v1281_v15  ;;  %v1408_v19 = vadd.s32 %v1406_v5, %v1400_v39  ;;  %v1410_v40 = vsel %vm1409_vm5, 1, %v2046_v2 }
 0x1b3   :  { %v1358_v60 = vsel %vm1354_vm4, %v1338_v8, %v2933_v9  ;;  %v1402_v54 = vshrl.u32 %v1398_v57, 16  ;;  %v1480_v61 = vand.u32 2139095040, %v2117_v49  ;;  %v1292_v62 = vsel %vm1169_vm1, %v1291_v42, %v2952_v38 }
 0x1b4   :  { %v1280_v13 = vor.u32 %v1279_v10, %v1278_v63  ;;  %v1283_v21 = vshll.u32 %v1282_v47, 23  ;;  %v1412_v56 = vadd.s32 %v1410_v40, %v1408_v19  ;;  %v1360_v45 = vsel %vm1356_vm8, %v2935_v55, %v1359_v24 }
 0x1b5   :  { %v1392_v33 = vadd.s32 %v1391_v43, %v1382_v58  ;;  %v1404_v7 = vshrl.u32 %v1399_v36, 16  ;;  %v1481_v20 = vshrl.u32 %v1480_v61, 23  ;;  %v1484_v9 = vand.u32 8388607, %v1477_v53 }
 0x1b6   :  { %v1284_v52 = vor.u32 4788187, %v1283_v21  ;;  %v1413_v32 = vadd.s32 %v1412_v56, %v1402_v54  ;;  %v1287_v27 = vcvt.s32.f32 %v1280_v13  ;;  %v1411_v34 = vadd.s32 %v1407_v59, %v1403_v22 }
 0x1b7   :  { %vm3009_vm3 = vcmp.le.f32.partialorder %v1167_v37, 0.7853982  ;;  %v1361_v38 = vsel %vm1355_vm6, %v1358_v60, %v1360_v45  ;;  %v1999_v26 = vadd.s32 4294967169, %v1481_v20  ;;  %v1485_v16 = vor.u32 8388608, %v1484_v9 }
 0x1b8   :  { %v1285_v8 = vand.u32 2147483647, %v1284_v52  ;;  %v1414_v55 = vadd.s32 %v1413_v32, %v1404_v7  ;;  %v1294_v31 = vsel %vm3009_vm3, 0, %v1292_v62  ;;  %vm1417_vm4 = vc.u32 %v1392_v33, %v1411_v34 }
 0x1b9   :  { %v1487_v36 = vadd.s32 1, %v1999_v26  ;;  %v1635_v30 = vand.u32 2139095040, %v2101_v29  ;;  %v1415_v37 = vmul.u32 %v2974_v51, %v1361_v38  ;;  %v1311_v18 = vadd.s32 3, %v1294_v31 }
 0x1ba   :  { %v1288_v57 = vmul.f32 %v1287_v27, %v1285_v8  ;;  %v1418_v42 = vadd.s32 1, %v1414_v55  ;;  %v3024_v44 = vshll.u32 %v1485_v16, 8  ;;  %vm1324_vm6 = vcmp.lt.s32.totalorder %v2099_v28, 0 }
 0x1bb   :  { %vm1488_vm7 = vcmp.gt.s32.totalorder %v1487_v36, 0  ;;  %v1636_v39 = vshrl.u32 %v1635_v30, 23  ;;  %v3028_v47 = vand.u32 3, %v1311_v18  ;;  %v3031_v5 = vadd.s32 %v1411_v34, %v1392_v33 }
 0x1bc   :  { %v1289_v12 = vxor.u32 2147483648, %v1288_v57  ;;  %v1419_v25 = vsel %vm1417_vm4, %v1418_v42, %v1414_v55  ;;  %v1489_v3 = vsel %vm1488_vm7, %v1487_v36, 0  ;;  %v3034_v24 = vand.u32 65535, %v3024_v44 }
 0x1bd   :  { %v1420_v35 = vadd.s32 %v1419_v25, %v1415_v37  ;;  %v1491_v15 = vand.u32 31, %v1489_v3  ;;  %v1632_v19 = vand.u32 2147483647, %v2101_v29  ;;  %v2002_v13 = vadd.s32 4294967169, %v1636_v39 }
 0x1be   :  { %v1290_v0 = vsel %vm1169_vm1, %v1289_v12, %v1288_v57  ;;  %v3038_v60 = vshrl.u32 %v3024_v44, 16  ;;  %v3040_v54 = vshrl.u32 %v1489_v3, 5  ;;  %vm1317_vm8 = vcmp.eq.s32.totalorder %v3028_v47, 2 }
 0x1bf   :  { %v1293_v46 = vsel %vm3009_vm3, %v2115_v48, %v1290_v0  ;;  %v1421_v22 = vadd.s32 536870912, %v1420_v35  ;;  %v3026_v59 = vsub.s32 32, %v1491_v15  ;;  %v1494_v56 = vshll.u32 %v2047_v1, %v1491_v15 }
 0x1c0   :  { %v1295_v63 = vmul.f32 %v1293_v46, %v1293_v46  ;;  %v1497_v20 = vshll.u32 %v2048_v4, %v1491_v15  ;;  %v1503_v8 = vshll.u32 %v2050_v11, %v1491_v15  ;;  %vm1314_vm10 = vcmp.eq.s32.totalorder %v3028_v47, 0 }
 0x1c1   :  { %v1422_v43 = vshrl.u32 %v1421_v22, 30  ;;  %v1495_v61 = vshrl.u32 %v2048_v4, %v3026_v59  ;;  %v1498_v52 = vshrl.u32 %v2049_v6, %v3026_v59  ;;  %v1504_v7 = vshrl.u32 %v2051_v14, %v3026_v59 }
 0x1c2   :  { %v1296_v51 = vmul.f32 -0.001358992, %v1295_v63  ;;  %v1303_v10 = vmul.f32 -0.00019511016, %v1295_v63  ;;  %v1501_v9 = vshrl.u32 %v2050_v11, %v3026_v59  ;;  %v1500_v26 = vshll.u32 %v2049_v6, %v1491_v15 }
 0x1c3   :  { %v1423_v40 = vshll.u32 %v1422_v43, 30  ;;  %v1446_v32 = vsub.s32 4, %v1422_v43  ;;  %v1496_v38 = vor.u32 %v1495_v61, %v1494_v56  ;;  %v3059_v55 = vor.u32 %v1498_v52, %v1497_v20 }
 0x1c4   :  { %v1297_v21 = vadd.f32 0.041655596, %v1296_v51  ;;  %v1304_v58 = vadd.f32 0.008332121, %v1303_v10  ;;  %v1507_v57 = vshrl.u32 %v2052_v17, %v3026_v59  ;;  %vm1313_vm12 = vcmp.lt.s32.totalorder %v3028_v47, 2 }
 0x1c5   :  { %v3047_v33 = vsub.s32 %v1420_v35, %v1423_v40  ;;  %v1505_v36 = vor.u32 %v1504_v7, %v1503_v8  ;;  %vm1310_vm11 = vweird.f32 %v2115_v48  ;;  %v1502_v12 = vor.u32 %v1501_v9, %v1500_v26 }
 0x1c6   :  { %v1298_v62 = vmul.f32 %v1297_v21, %v1295_v63  ;;  %v1305_v45 = vmul.f32 %v1304_v58, %v1295_v63  ;;  %v1506_v37 = vshll.u32 %v2051_v14, %v1491_v15  ;;  %v3068_v25 = vadd.s32 1, %v2002_v13 }
 0x1c7   :  { %vm1425_vm9 = vcmp.lt.s32.totalorder %v3047_v33, 0  ;;  %v1426_v41 = vsub.s32 0, %v3047_v33  ;;  %v3072_v35 = vsel %vm1324_vm6, %v1446_v32, %v1422_v43  ;;  %vm1509_vm13 = vcmp.lt.s32.totalorder %v3040_v54, 1 }
 0x1c8   :  { %v1299_v27 = vadd.f32 -0.4999988, %v1298_v62  ;;  %v1306_v34 = vadd.f32 -0.16666654, %v1305_v45  ;;  %vm3077_vm14 = vcmp.le.f32.partialorder %v1322_v23, 0.7853982  ;;  %v1517_v15 = vsel %vm1509_vm13, %v1496_v38, %v3059_v55 }
 0x1c9   :  { %v1427_v16 = vsel %vm1425_vm9, %v1426_v41, %v3047_v33  ;;  %vm1512_vm1 = vcmp.lt.s32.totalorder %v3040_v54, 4  ;;  %vm1511_vm15 = vcmp.lt.s32.totalorder %v3040_v54, 3  ;;  %vm1510_vm2 = vcmp.lt.s32.totalorder %v3040_v54, 2 }
 0x1ca   :  { %v1300_v31 = vmul.f32 %v1299_v27, %v1295_v63  ;;  %v1307_v42 = vmul.f32 %v1306_v34, %v1295_v63  ;;  %v1428_v30 = vclz %v1427_v16  ;;  %v1508_v63 = vor.u32 %v1507_v57, %v1506_v37 }
 0x1cb   :  { %v1518_v10 = vsel %vm1512_vm1, %v1505_v36, 920167782  ;;  %v1521_v43 = vsel %vm1509_vm13, %v3059_v55, %v1502_v12  ;;  %vm1643_vm5 = vcmp.gt.s32.totalorder %v3068_v25, 0  ;;  %v1493_v34 = vshrl.u32 %v2047_v1, %v3026_v59 }
 0x1cc   :  { %v1301_v0 = vadd.f32 1.0, %v1300_v31  ;;  %v1308_v18 = vadd.f32 1.0, %v1307_v42  ;;  %v1997_v39 = vadd.s32 4294967294, %v1428_v30  ;;  %v1519_v23 = vsel %vm1511_vm15, %v1502_v12, %v1518_v10 }
 0x1cd   :  { %v1520_v58 = vsel %vm1510_vm2, %v1517_v15, %v1519_v23  ;;  %v1522_v52 = vsel %vm1512_vm1, %v1508_v63, 1326507024  ;;  %v1449_v42 = vsel %vm3077_vm14, 0, %v3072_v35  ;;  %v1513_v48 = vsel %vm1509_vm13, %v1493_v34, %v1496_v38 }
 0x1ce   :  { %v1309_v22 = vmul.f32 %v1308_v18, %v1293_v46  ;;  %v1318_v51 = vxor.u32 2147483648, %v1301_v0  ;;  %vm1998_vm0 = vcmp.lt.s32.totalorder %v1997_v39, 0  ;;  %v1523_v45 = vsel %vm1511_vm15, %v1505_v36, %v1522_v52 }
 0x1cf   :  { %v1431_v21 = vsel %vm1998_vm0, 0, %v1997_v39  ;;  %v1550_v7 = vand.u32 65535, %v1520_v58  ;;  %v1551_v32 = vshrl.u32 %v1520_v58, 16  ;;  %v1514_v30 = vsel %vm1512_vm1, %v1502_v12, 2102212464 }
 0x1d0   :  { %v1315_v13 = vxor.u32 2147483648, %v1309_v22  ;;  %v1319_v46 = vsel %vm1317_vm8, %v1318_v51, %v1309_v22  ;;  %v1432_v40 = vsub.s32 32, %v1431_v21  ;;  %v1433_v56 = vshll.u32 %v3047_v33, %v1431_v21 }
 0x1d1   :  { %v1436_v61 = vsub.s32 4294967266, %v1431_v21  ;;  %v1524_v33 = vsel %vm1510_vm2, %v1521_v43, %v1523_v45  ;;  %v1553_v47 = vmul.u32 %v1551_v32, %v3034_v24  ;;  %v1552_v37 = vmul.u32 %v1550_v7, %v3034_v24 }
 0x1d2   :  { %v1316_v62 = vsel %vm1314_vm10, %v1301_v0, %v1315_v13  ;;  %v1434_v9 = vshrl.u32 %v3031_v5, %v1432_v40  ;;  %v1528_v41 = vand.u32 65535, %v1524_v33  ;;  %v1529_v26 = vshrl.u32 %v1524_v33, 16 }
 0x1d3   :  { %v1320_v20 = vsel %vm1313_vm12, %v1316_v62, %v1319_v46  ;;  %v1437_v8 = vadd.s32 127, %v1436_v61  ;;  %v1554_v5 = vmul.u32 %v1550_v7, %v3038_v60  ;;  %v1556_v0 = vshll.u32 %v1553_v47, 16 }
 0x1d4   :  { %v1321_v27 = vsel %vm1310_vm11, nan, %v1320_v20  ;;  %v1435_v57 = vor.u32 %v1434_v9, %v1433_v56  ;;  %v1531_v16 = vmul.u32 %v1529_v26, %v3034_v24  ;;  %v1532_v59 = vmul.u32 %v1528_v41, %v3038_v60 }
 0x1d5   :  { %v1438_v31 = vshll.u32 %v1437_v8, 23  ;;  %1949 = vst [vmem:[#allocation2 + $0x38] sm:$0xf] %v1321_v27  ;;  %v1530_v39 = vmul.u32 %v1528_v41, %v3034_v24  ;;  %v1533_v63 = vmul.u32 %v1529_v26, %v3038_v60  ;;  %v1555_v38 = vmul.u32 %v1551_v32, %v3038_v60 }
 0x1d6   :  { %v1442_v18 = vcvt.s32.f32 %v1435_v57  ;;  %v1534_v35 = vshll.u32 %v1531_v16, 16  ;;  %v1536_v22 = vshll.u32 %v1532_v59, 16  ;;  %v1558_v51 = vshll.u32 %v1554_v5, 16 }
 0x1d7   :  { %v1439_v36 = vor.u32 4788187, %v1438_v31  ;;  %vm1560_vm4 = vc.u32 %v1552_v37, %v1556_v0  ;;  %v1562_v23 = vadd.s32 %v1556_v0, %v1552_v37  ;;  %v1515_v12 = vsel %vm1511_vm15, %v3059_v55, %v1514_v30 }
 0x1d8   :  { %vm1538_vm3 = vc.u32 %v1530_v39, %v1534_v35  ;;  %v1540_v10 = vadd.s32 %v1534_v35, %v1530_v39  ;;  %v1561_v24 = vsel %vm1560_vm4, 1, %v2046_v2  ;;  %v1535_v60 = vshrl.u32 %v1531_v16, 16 }
 0x1d9   :  { %v1440_v15 = vand.u32 2147483647, %v1439_v36  ;;  %v1539_v13 = vsel %vm1538_vm3, 1, %v2046_v2  ;;  %v1563_v21 = vadd.s32 %v1561_v24, %v1555_v38  ;;  %vm1564_vm8 = vc.u32 %v1562_v23, %v1558_v51 }
 0x1da   :  { %v1541_v46 = vadd.s32 %v1539_v13, %v1533_v63  ;;  %vm1542_vm7 = vc.u32 %v1540_v10, %v1536_v22  ;;  %v1565_v56 = vsel %vm1564_vm8, 1, %v2046_v2  ;;  %v1557_v52 = vshrl.u32 %v1553_v47, 16 }
 0x1db   :  { %v1443_v43 = vmul.f32 %v1442_v18, %v1440_v15  ;;  %v1543_v40 = vsel %vm1542_vm7, 1, %v2046_v2  ;;  %v1567_v62 = vadd.s32 %v1565_v56, %v1563_v21  ;;  %v1644_v55 = vsel %vm1643_vm5, %v3068_v25, 0 }
 0x1dc   :  { %v1545_v61 = vadd.s32 %v1543_v40, %v1541_v46  ;;  %v1516_v7 = vsel %vm1510_vm2, %v1513_v48, %v1515_v12  ;;  %v1537_v32 = vshrl.u32 %v1532_v59, 16  ;;  %v1646_v20 = vand.u32 31, %v1644_v55 }
 0x1dd   :  { %v1444_v58 = vxor.u32 2147483648, %v1443_v43  ;;  %v1559_v33 = vshrl.u32 %v1554_v5, 16  ;;  %v1568_v27 = vadd.s32 %v1567_v62, %v1557_v52  ;;  %v1639_v41 = vand.u32 8388607, %v1632_v19 }
 0x1de   :  { %v1546_v8 = vadd.s32 %v1545_v61, %v1535_v60  ;;  %v3149_v25 = vsub.s32 32, %v1646_v20  ;;  %v1466_v26 = vadd.s32 3, %v1449_v42  ;;  %v3153_v54 = vadd.s32 %v1562_v23, %v1558_v51 }
 0x1df   :  { %v1445_v45 = vsel %vm1324_vm6, %v1444_v58, %v1443_v43  ;;  %v1569_v31 = vadd.s32 %v1568_v27, %v1559_v33  ;;  %v1570_v3 = vmul.u32 %v3024_v44, %v1516_v7  ;;  %v3156_v16 = vshrl.u32 %v1644_v55, 5 }
 0x1e0   :  { %v1448_v9 = vsel %vm3077_vm14, %v2099_v28, %v1445_v45  ;;  %v3151_v57 = vadd.s32 %v1546_v8, %v1537_v32  ;;  %v1649_v59 = vshll.u32 %v2047_v1, %v1646_v20  ;;  %v1653_v42 = vshrl.u32 %v2049_v6, %v3149_v25 }
 0x1e1   :  { %v1450_v34 = vmul.f32 %v1448_v9, %v1448_v9  ;;  %v1573_v5 = vadd.s32 1, %v1569_v31  ;;  %v1652_v37 = vshll.u32 %v2048_v4, %v1646_v20  ;;  %v1656_v0 = vshrl.u32 %v2050_v11, %v3149_v25 }
 0x1e2   :  { %vm1572_vm6 = vc.u32 %v3151_v57, %v3153_v54  ;;  %v1650_v44 = vshrl.u32 %v2048_v4, %v3149_v25  ;;  %v1658_v39 = vshll.u32 %v2050_v11, %v1646_v20  ;;  %v1659_v63 = vshrl.u32 %v2051_v14, %v3149_v25 }
 0x1e3   :  { %v1451_v47 = vmul.f32 -0.001358992, %v1450_v34  ;;  %v1458_v48 = vmul.f32 -0.00019511016, %v1450_v34  ;;  %v1574_v18 = vsel %vm1572_vm6, %v1573_v5, %v1569_v31  ;;  %v1655_v38 = vshll.u32 %v2049_v6, %v1646_v20 }
 0x1e4   :  { %v1575_v22 = vadd.s32 %v1574_v18, %v1570_v3  ;;  %v3172_v51 = vor.u32 %v1653_v42, %v1652_v37  ;;  %v1660_v10 = vor.u32 %v1659_v63, %v1658_v39  ;;  %v1661_v23 = vshll.u32 %v2051_v14, %v1646_v20 }
 0x1e5   :  { %v1452_v36 = vadd.f32 0.041655596, %v1451_v47  ;;  %v1459_v30 = vadd.f32 0.008332121, %v1458_v48  ;;  %v1662_v43 = vshrl.u32 %v2052_v17, %v3149_v25  ;;  %v3177_v46 = vor.u32 %v1656_v0, %v1655_v38 }
 0x1e6   :  { %v1576_v24 = vadd.s32 536870912, %v1575_v22  ;;  %v1467_v21 = vand.u32 3, %v1466_v26  ;;  %v1640_v58 = vor.u32 8388608, %v1639_v41  ;;  %v3179_v60 = vor.u32 %v1650_v44, %v1649_v59 }
 0x1e7   :  { %v1453_v35 = vmul.f32 %v1452_v36, %v1450_v34  ;;  %v1460_v15 = vmul.f32 %v1459_v30, %v1450_v34  ;;  %v1663_v40 = vor.u32 %v1662_v43, %v1661_v23  ;;  %vm1667_vm9 = vcmp.lt.s32.totalorder %v3156_v16, 4 }
 0x1e8   :  { %v3181_v52 = vshrl.u32 %v1576_v24, 30  ;;  %vm1664_vm10 = vcmp.lt.s32.totalorder %v3156_v16, 1  ;;  %vm1666_vm12 = vcmp.lt.s32.totalorder %v3156_v16, 3  ;;  %v1673_v62 = vsel %vm1667_vm9, %v1660_v10, 920167782 }
 0x1e9   :  { %v1454_v12 = vadd.f32 -0.4999988, %v1453_v35  ;;  %v1461_v13 = vadd.f32 -0.16666654, %v1460_v15  ;;  %v1677_v55 = vsel %vm1667_vm9, %v1663_v40, 1326507024  ;;  %v1676_v20 = vsel %vm1664_vm10, %v3172_v51, %v3177_v46 }
 0x1ea   :  { %v1578_v32 = vshll.u32 %v3181_v52, 30  ;;  %v1672_v8 = vsel %vm1664_vm10, %v3179_v60, %v3172_v51  ;;  %v1674_v33 = vsel %vm1666_vm12, %v3177_v46, %v1673_v62  ;;  %v1678_v27 = vsel %vm1666_vm12, %v1660_v10, %v1677_v55 }
 0x1eb   :  { %v1455_v56 = vmul.f32 %v1454_v12, %v1450_v34  ;;  %v1462_v61 = vmul.f32 %v1461_v13, %v1450_v34  ;;  %v3204_v34 = vshll.u32 %v1640_v58, 8  ;;  %vm1665_vm11 = vcmp.lt.s32.totalorder %v3156_v16, 2 }
 0x1ec   :  { %v1579_v31 = vsub.s32 %v1575_v22, %v1578_v32  ;;  %vm1468_vm13 = vcmp.lt.s32.totalorder %v1467_v21, 2  ;;  %vm1469_vm14 = vcmp.eq.s32.totalorder %v1467_v21, 0  ;;  %v1679_v47 = vsel %vm1665_vm11, %v1676_v20, %v1678_v27 }
 0x1ed   :  { %v1456_v45 = vadd.f32 1.0, %v1455_v56  ;;  %v1463_v7 = vadd.f32 1.0, %v1462_v61  ;;  %v1675_v5 = vsel %vm1665_vm11, %v1672_v8, %v1674_v33  ;;  %vm1472_vm15 = vcmp.eq.s32.totalorder %v1467_v21, 2 }
 0x1ee   :  { %vm1580_vm1 = vcmp.lt.s32.totalorder %v1579_v31, 0  ;;  %v1581_v3 = vsub.s32 0, %v1579_v31  ;;  %v1681_v59 = vand.u32 65535, %v3204_v34  ;;  %v1683_v42 = vand.u32 65535, %v1679_v47 }
 0x1ef   :  { %v1464_v41 = vmul.f32 %v1463_v7, %v1448_v9  ;;  %v1473_v26 = vxor.u32 2147483648, %v1456_v45  ;;  %v1684_v9 = vshrl.u32 %v1679_v47, 16  ;;  %v1682_v0 = vshrl.u32 %v3204_v34, 16 }
 0x1f0   :  { %v1582_v37 = vsel %vm1580_vm1, %v1581_v3, %v1579_v31  ;;  %vm1465_vm0 = vweird.f32 %v2099_v28  ;;  %v1706_v39 = vshrl.u32 %v1675_v5, 16  ;;  %v1705_v22 = vand.u32 65535, %v1675_v5 }
 0x1f1   :  { %v1470_v48 = vxor.u32 2147483648, %v1464_v41  ;;  %v1474_v30 = vsel %vm1472_vm15, %v1473_v26, %v1464_v41  ;;  %v1583_v44 = vclz %v1582_v37  ;;  %v1686_v35 = vmul.u32 %v1684_v9, %v1681_v59 }
 0x1f2   :  { %v1687_v15 = vmul.u32 %v1683_v42, %v1682_v0  ;;  %v1571_v10 = vadd.s32 %v3153_v54, %v3151_v57  ;;  %v1685_v23 = vmul.u32 %v1683_v42, %v1681_v59  ;;  %v1688_v43 = vmul.u32 %v1684_v9, %v1682_v0 }
 0x1f3   :  { %v1471_v36 = vsel %vm1469_vm14, %v1456_v45, %v1470_v48  ;;  %v2000_v38 = vadd.s32 4294967294, %v1583_v44  ;;  %v1689_v12 = vshll.u32 %v1686_v35, 16  ;;  %v1690_v13 = vshrl.u32 %v1686_v35, 16 }
 0x1f4   :  { %v1475_v18 = vsel %vm1468_vm13, %v1471_v36, %v1474_v30  ;;  %v1691_v24 = vshll.u32 %v1687_v15, 16  ;;  %v1708_v28 = vmul.u32 %v1706_v39, %v1681_v59  ;;  %v1709_v40 = vmul.u32 %v1705_v22, %v1682_v0 }
 0x1f5   :  { %v1476_v63 = vsel %vm1465_vm0, nan, %v1475_v18  ;;  %vm2001_vm2 = vcmp.lt.s32.totalorder %v2000_v38, 0  ;;  %vm1693_vm5 = vc.u32 %v1685_v23, %v1689_v12  ;;  %v1695_v58 = vadd.s32 %v1689_v12, %v1685_v23 }
 0x1f6   :  { %1950 = vst [vmem:[#allocation2 + $0x40] sm:$0xff] %v1476_v63  ;;  %v1586_v21 = vsel %vm2001_vm2, 0, %v2000_v38  ;;  %v1694_v62 = vsel %vm1693_vm5, 1, %v2046_v2  ;;  %v1707_v55 = vmul.u32 %v1705_v22, %v1681_v59  ;;  %v1710_v7 = vmul.u32 %v1706_v39, %v1682_v0 }
 0x1f7   :  { %v1587_v56 = vsub.s32 32, %v1586_v21  ;;  %v1591_v61 = vsub.s32 4294967266, %v1586_v21  ;;  %v1696_v45 = vadd.s32 %v1694_v62, %v1688_v43  ;;  %vm1697_vm3 = vc.u32 %v1695_v58, %v1691_v24 }
 0x1f8   :  { %v1711_v57 = vshll.u32 %v1708_v28, 16  ;;  %v1588_v54 = vshll.u32 %v1579_v31, %v1586_v21  ;;  %v1698_v8 = vsel %vm1697_vm3, 1, %v2046_v2  ;;  %v1713_v27 = vshll.u32 %v1709_v40, 16 }
 0x1f9   :  { %v1589_v32 = vshrl.u32 %v1571_v10, %v1587_v56  ;;  %v1592_v20 = vadd.s32 127, %v1591_v61  ;;  %v1700_v33 = vadd.s32 %v1698_v8, %v1696_v45  ;;  %v1648_v48 = vshrl.u32 %v2047_v1, %v3149_v25 }
 0x1fa   :  { %vm1715_vm4 = vc.u32 %v1707_v55, %v1711_v57  ;;  %v1717_v41 = vadd.s32 %v1711_v57, %v1707_v55  ;;  %v1669_v5 = vsel %vm1667_vm9, %v3177_v46, 2102212464  ;;  %v1692_v36 = vshrl.u32 %v1687_v15, 16 }
 0x1fb   :  { %v1590_v26 = vor.u32 %v1589_v32, %v1588_v54  ;;  %v1593_v47 = vshll.u32 %v1592_v20, 23  ;;  %v1716_v3 = vsel %vm1715_vm4, 1, %v2046_v2  ;;  %v1701_v31 = vadd.s32 %v1700_v33, %v1690_v13 }
 0x1fc   :  { %v1718_v59 = vadd.s32 %v1716_v3, %v1710_v7  ;;  %vm1719_vm7 = vc.u32 %v1717_v41, %v1713_v27  ;;  %v1668_v9 = vsel %vm1664_vm10, %v1648_v48, %v3179_v60  ;;  %v1601_v37 = vsub.s32 4, %v3181_v52 }
 0x1fd   :  { %v1594_v42 = vor.u32 4788187, %v1593_v47  ;;  %v1720_v30 = vsel %vm1719_vm7, 1, %v2046_v2  ;;  %v1712_v25 = vshrl.u32 %v1708_v28, 16  ;;  %v1790_v18 = vand.u32 2139095040, %v2119_v50 }
 0x1fe   :  { %v1722_v0 = vadd.s32 %v1720_v30, %v1718_v59  ;;  %v1597_v39 = vcvt.s32.f32 %v1590_v26  ;;  %v1670_v46 = vsel %vm1666_vm12, %v3172_v51, %v1669_v5  ;;  %v3234_v63 = vadd.s32 %v1701_v31, %v1692_v36 }
 0x1ff   :  { %v1595_v44 = vand.u32 2147483647, %v1594_v42  ;;  %v1714_v35 = vshrl.u32 %v1709_v40, 16  ;;  %v1791_v60 = vshrl.u32 %v1790_v18, 23  ;;  %vm1479_vm8 = vcmp.lt.s32.totalorder %v2117_v49, 0 }
 0x200   :  { %v1723_v22 = vadd.s32 %v1722_v0, %v1712_v25  ;;  %v3237_v38 = vadd.s32 %v1717_v41, %v1713_v27  ;;  %v1787_v10 = vand.u32 2147483647, %v2119_v50  ;;  %v1602_v23 = vsel %vm1479_vm8, %v1601_v37, %v3181_v52 }
 0x201   :  { %v1598_v15 = vmul.f32 %v1597_v39, %v1595_v44  ;;  %v1671_v43 = vsel %vm1665_vm11, %v1668_v9, %v1670_v46  ;;  %v2005_v13 = vadd.s32 4294967169, %v1791_v60  ;;  %vm1478_vm9 = vcmp.le.f32.partialorder %v1477_v53, 0.7853982 }
 0x202   :  { %v1724_v12 = vadd.s32 %v1723_v22, %v1714_v35  ;;  %vm1727_vm6 = vc.u32 %v3234_v63, %v3237_v38  ;;  %v1604_v58 = vsel %vm1478_vm9, 0, %v1602_v23  ;;  %v1725_v40 = vmul.u32 %v3204_v34, %v1671_v43 }
 0x203   :  { %v1599_v51 = vxor.u32 2147483648, %v1598_v15  ;;  %v1797_v28 = vadd.s32 1, %v2005_v13  ;;  %v1794_v52 = vand.u32 8388607, %v1787_v10  ;;  %v1621_v45 = vadd.s32 3, %v1604_v58 }
 0x204   :  { %v1728_v24 = vadd.s32 1, %v1724_v12  ;;  %vm1620_vm14 = vweird.f32 %v2117_v49  ;;  %vm1634_vm4 = vcmp.lt.s32.totalorder %v2101_v29, 0  ;;  %vm3319_vm7 = vcmp.le.f32.partialorder %v1632_v19, 0.7853982 }
 0x205   :  { %v1600_v21 = vsel %vm1479_vm8, %v1599_v51, %v1598_v15  ;;  %vm1798_vm10 = vcmp.gt.s32.totalorder %v1797_v28, 0  ;;  %v1795_v32 = vor.u32 8388608, %v1794_v52  ;;  %v1622_v27 = vand.u32 3, %v1621_v45 }
 0x206   :  { %v1603_v16 = vsel %vm1478_vm9, %v2117_v49, %v1600_v21  ;;  %v1729_v56 = vsel %vm1727_vm6, %v1728_v24, %v1724_v12  ;;  %v1799_v55 = vsel %vm1798_vm10, %v1797_v28, 0 }
 0x207   :  { %v1605_v61 = vmul.f32 %v1603_v16, %v1603_v16  ;;  %v1730_v62 = vadd.s32 %v1729_v56, %v1725_v40  ;;  %v1801_v7 = vand.u32 31, %v1799_v55  ;;  %v3256_v48 = vshll.u32 %v1795_v32, 8 }
 0x208   :  { %v3258_v3 = vshrl.u32 %v1799_v55, 5  ;;  %vm1624_vm12 = vcmp.eq.s32.totalorder %v1622_v27, 0  ;;  %vm1623_vm11 = vcmp.lt.s32.totalorder %v1622_v27, 2  ;;  %vm1627_vm1 = vcmp.eq.s32.totalorder %v1622_v27, 2 }
 0x209   :  { %v1606_v57 = vmul.f32 -0.001358992, %v1605_v61  ;;  %v1613_v53 = vmul.f32 -0.00019511016, %v1605_v61  ;;  %v1731_v54 = vadd.s32 536870912, %v1730_v62  ;;  %v3251_v20 = vsub.s32 32, %v1801_v7 }
 0x20a   :  { %v1804_v30 = vshll.u32 %v2047_v1, %v1801_v7  ;;  %v1807_v37 = vshll.u32 %v2048_v4, %v1801_v7  ;;  %v1813_v0 = vshll.u32 %v2050_v11, %v1801_v7  ;;  %v1816_v43 = vshll.u32 %v2051_v14, %v1801_v7 }
 0x20b   :  { %v1607_v8 = vadd.f32 0.041655596, %v1606_v57  ;;  %v1614_v34 = vadd.f32 0.008332121, %v1613_v53  ;;  %v3253_v33 = vshrl.u32 %v1731_v54, 30  ;;  %v1805_v5 = vshrl.u32 %v2048_v4, %v3251_v20 }
 0x20c   :  { %v1808_v31 = vshrl.u32 %v2049_v6, %v3251_v20  ;;  %v1814_v59 = vshrl.u32 %v2051_v14, %v3251_v20  ;;  %v1811_v25 = vshrl.u32 %v2050_v11, %v3251_v20  ;;  %v1817_v18 = vshrl.u32 %v2052_v17, %v3251_v20 }
 0x20d   :  { %v1608_v41 = vmul.f32 %v1607_v8, %v1605_v61  ;;  %v1615_v26 = vmul.f32 %v1614_v34, %v1605_v61  ;;  %v1733_v47 = vshll.u32 %v3253_v33, 30  ;;  %v3274_v35 = vor.u32 %v1805_v5, %v1804_v30 }
 0x20e   :  { %v3276_v22 = vor.u32 %v1808_v31, %v1807_v37  ;;  %v1810_v4 = vshll.u32 %v2049_v6, %v1801_v7  ;;  %v1815_v60 = vor.u32 %v1814_v59, %v1813_v0  ;;  %v1726_v17 = vadd.s32 %v3237_v38, %v3234_v63 }
 0x20f   :  { %v1609_v42 = vadd.f32 -0.4999988, %v1608_v41  ;;  %v1616_v9 = vadd.f32 -0.16666654, %v1615_v26  ;;  %v1734_v36 = vsub.s32 %v1730_v62, %v1733_v47  ;;  %v1818_v28 = vor.u32 %v1817_v18, %v1816_v43 }
 0x210   :  { %v3282_v13 = vor.u32 %v1811_v25, %v1810_v4  ;;  %vm1819_vm15 = vcmp.lt.s32.totalorder %v3258_v3, 1  ;;  %vm1822_vm0 = vcmp.lt.s32.totalorder %v3258_v3, 4  ;;  %v1836_v14 = vand.u32 65535, %v3256_v48 }
 0x211   :  { %v1610_v44 = vmul.f32 %v1609_v42, %v1605_v61  ;;  %v1617_v39 = vmul.f32 %v1616_v9, %v1605_v61  ;;  %vm1735_vm13 = vcmp.lt.s32.totalorder %v1734_v36, 0  ;;  %v1736_v46 = vsub.s32 0, %v1734_v36 }
 0x212   :  { %v1827_v6 = vsel %vm1819_vm15, %v3274_v35, %v3276_v22  ;;  %vm1820_vm2 = vcmp.lt.s32.totalorder %v3258_v3, 2  ;;  %vm1821_vm5 = vcmp.lt.s32.totalorder %v3258_v3, 3  ;;  %v1828_v63 = vsel %vm1822_vm0, %v1815_v60, 920167782 }
 0x213   :  { %v1611_v15 = vadd.f32 1.0, %v1610_v44  ;;  %v1618_v23 = vadd.f32 1.0, %v1617_v39  ;;  %v1737_v11 = vsel %vm1735_vm13, %v1736_v46, %v1734_v36  ;;  %v1829_v40 = vsel %vm1821_vm5, %v3282_v13, %v1828_v63 }
 0x214   :  { %v1738_v12 = vclz %v1737_v11  ;;  %v1831_v52 = vsel %vm1819_vm15, %v3276_v22, %v3282_v13  ;;  %v1830_v61 = vsel %vm1820_vm2, %v1827_v6, %v1829_v40  ;;  %v1832_v62 = vsel %vm1822_vm0, %v1818_v28, 1326507024 }
 0x215   :  { %v1619_v51 = vmul.f32 %v1618_v23, %v1603_v16  ;;  %v1628_v24 = vxor.u32 2147483648, %v1611_v15  ;;  %v1837_v57 = vshrl.u32 %v3256_v48, 16  ;;  %v1833_v54 = vsel %vm1821_vm5, %v1815_v60, %v1832_v62 }
 0x216   :  { %v2003_v21 = vadd.s32 4294967294, %v1738_v12  ;;  %v1860_v32 = vand.u32 65535, %v1830_v61  ;;  %v1861_v8 = vshrl.u32 %v1830_v61, 16  ;;  %v1834_v47 = vsel %vm1820_vm2, %v1831_v52, %v1833_v54 }
 0x217   :  { %v1625_v58 = vxor.u32 2147483648, %v1619_v51  ;;  %v1629_v38 = vsel %vm1627_vm1, %v1628_v24, %v1619_v51  ;;  %v1838_v27 = vand.u32 65535, %v1834_v47  ;;  %v1839_v5 = vshrl.u32 %v1834_v47, 16 }
 0x218   :  { %vm2004_vm3 = vcmp.lt.s32.totalorder %v2003_v21, 0  ;;  %v1863_v31 = vmul.u32 %v1861_v8, %v1836_v14  ;;  %v1864_v9 = vmul.u32 %v1860_v32, %v1837_v57  ;;  %v1862_v25 = vmul.u32 %v1860_v32, %v1836_v14 }
 0x219   :  { %v1626_v16 = vsel %vm1624_vm12, %v1611_v15, %v1625_v58  ;;  %v1741_v56 = vsel %vm2004_vm3, 0, %v2003_v21  ;;  %v1841_v49 = vmul.u32 %v1839_v5, %v1836_v14  ;;  %v1842_v30 = vmul.u32 %v1838_v27, %v1837_v57 }
 0x21a   :  { %v1630_v55 = vsel %vm1623_vm11, %v1626_v16, %v1629_v38  ;;  %v1742_v45 = vsub.s32 32, %v1741_v56  ;;  %v1746_v7 = vsub.s32 4294967266, %v1741_v56  ;;  %v1743_v34 = vshll.u32 %v1734_v36, %v1741_v56 }
 0x21b   :  { %v1631_v53 = vsel %vm1620_vm14, nan, %v1630_v55  ;;  %v1865_v0 = vmul.u32 %v1861_v8, %v1837_v57  ;;  %v1866_v18 = vshll.u32 %v1863_v31, 16  ;;  %v1840_v39 = vmul.u32 %v1838_v27, %v1836_v14 }
 0x21c   :  { %v1744_v41 = vshrl.u32 %v1726_v17, %v1742_v45  ;;  %v1747_v26 = vadd.s32 127, %v1746_v7  ;;  %1951 = vst [vmem:[#allocation2 + $0x48] sm:$0xf] %v1631_v53  ;;  %v1843_v46 = vmul.u32 %v1839_v5, %v1837_v57  ;;  %v1844_v4 = vshll.u32 %v1841_v49, 16 }
 0x21d   :  { %v1846_v15 = vshll.u32 %v1842_v30, 16  ;;  %v1868_v23 = vshll.u32 %v1864_v9, 16  ;;  %vm1870_vm8 = vc.u32 %v1862_v25, %v1866_v18  ;;  %v1872_v19 = vadd.s32 %v1866_v18, %v1862_v25 }
 0x21e   :  { %v1745_v59 = vor.u32 %v1744_v41, %v1743_v34  ;;  %v1748_v42 = vshll.u32 %v1747_v26, 23  ;;  %vm1848_vm6 = vc.u32 %v1840_v39, %v1844_v4  ;;  %v1850_v11 = vadd.s32 %v1844_v4, %v1840_v39 }
 0x21f   :  { %v1871_v43 = vsel %vm1870_vm8, 1, %v2046_v2  ;;  %v1803_v12 = vshrl.u32 %v2047_v1, %v3251_v20  ;;  %v1849_v51 = vsel %vm1848_vm6, 1, %v2046_v2  ;;  %v1824_v28 = vsel %vm1822_vm0, %v3282_v13, 2102212464 }
 0x220   :  { %v1749_v37 = vor.u32 4788187, %v1748_v42  ;;  %v1752_v44 = vcvt.s32.f32 %v1745_v59  ;;  %v1873_v24 = vadd.s32 %v1871_v43, %v1865_v0  ;;  %v1851_v21 = vadd.s32 %v1849_v51, %v1843_v46 }
 0x221   :  { %vm1852_vm9 = vc.u32 %v1850_v11, %v1846_v15  ;;  %vm1874_vm10 = vc.u32 %v1872_v19, %v1868_v23  ;;  %v1756_v14 = vsub.s32 4, %v3253_v33  ;;  %v1845_v38 = vshrl.u32 %v1841_v49, 16 }
 0x222   :  { %v1750_v60 = vand.u32 2147483647, %v1749_v37  ;;  %v1853_v58 = vsel %vm1852_vm9, 1, %v2046_v2  ;;  %v1875_v63 = vsel %vm1874_vm10, 1, %v2046_v2  ;;  %v1867_v1 = vshrl.u32 %v1863_v31, 16 }
 0x223   :  { %v1855_v40 = vadd.s32 %v1853_v58, %v1851_v21  ;;  %v1877_v20 = vadd.s32 %v1875_v63, %v1873_v24  ;;  %v1823_v13 = vsel %vm1819_vm15, %v1803_v12, %v3274_v35  ;;  %v1825_v16 = vsel %vm1821_vm5, %v3276_v22, %v1824_v28 }
 0x224   :  { %v1753_v17 = vmul.f32 %v1752_v44, %v1750_v60  ;;  %v1847_v56 = vshrl.u32 %v1842_v30, 16  ;;  %v1869_v62 = vshrl.u32 %v1864_v9, 16  ;;  %v1826_v7 = vsel %vm1820_vm2, %v1823_v13, %v1825_v16 }
 0x225   :  { %v1856_v61 = vadd.s32 %v1855_v40, %v1845_v38  ;;  %v1878_v55 = vadd.s32 %v1877_v20, %v1867_v1  ;;  %v1876_v53 = vadd.s32 %v1872_v19, %v1868_v23  ;;  %v1757_v22 = vsel %vm1634_vm4, %v1756_v14, %v3253_v33 }
 0x226   :  { %v1754_v6 = vxor.u32 2147483648, %v1753_v17  ;;  %v1880_v26 = vmul.u32 %v3256_v48, %v1826_v7  ;;  %v1759_v3 = vsel %vm3319_vm7, 0, %v1757_v22  ;;  %vm1775_vm15 = vweird.f32 %v2101_v29 }
 0x227   :  { %v1857_v57 = vadd.s32 %v1856_v61, %v1847_v56  ;;  %v1879_v54 = vadd.s32 %v1878_v55, %v1869_v62  ;;  %v1776_v49 = vadd.s32 3, %v1759_v3  ;;  %vm1789_vm2 = vcmp.lt.s32.totalorder %v2119_v50, 0 }
 0x228   :  { %v1755_v52 = vsel %vm1634_vm4, %v1754_v6, %v1753_v17  ;;  %vm1788_vm5 = vcmp.le.f32.partialorder %v1787_v10, 0.7853982  ;;  %vm1930_vm8 = vweird.f32 %v2119_v50 }
 0x229   :  { %v1758_v2 = vsel %vm3319_vm7, %v2101_v29, %v1755_v52  ;;  %vm1882_vm12 = vc.u32 %v1857_v57, %v1876_v53  ;;  %v1883_v8 = vadd.s32 1, %v1879_v54  ;;  %v1777_v44 = vand.u32 3, %v1776_v49 }
 0x22a   :  { %v1760_v45 = vmul.f32 %v1758_v2, %v1758_v2  ;;  %v1881_v51 = vadd.s32 %v1876_v53, %v1857_v57 }
 0x22b   :  { %v1884_v47 = vsel %vm1882_vm12, %v1883_v8, %v1879_v54  ;;  %vm1779_vm13 = vcmp.eq.s32.totalorder %v1777_v44, 0  ;;  %vm1782_vm14 = vcmp.eq.s32.totalorder %v1777_v44, 2  ;;  %vm1778_vm1 = vcmp.lt.s32.totalorder %v1777_v44, 2 }
 0x22c   :  { %v1761_v35 = vmul.f32 -0.001358992, %v1760_v45  ;;  %v1768_v32 = vmul.f32 -0.00019511016, %v1760_v45  ;;  %v1885_v31 = vadd.s32 %v1884_v47, %v1880_v26 }
 0x22e   :  { %v1762_v34 = vadd.f32 0.041655596, %v1761_v35  ;;  %v1769_v41 = vadd.f32 0.008332121, %v1768_v32  ;;  %v1886_v9 = vadd.s32 536870912, %v1885_v31 }
 0x230   :  { %v1763_v27 = vmul.f32 %v1762_v34, %v1760_v45  ;;  %v1770_v5 = vmul.f32 %v1769_v41, %v1760_v45  ;;  %v1887_v33 = vshrl.u32 %v1886_v9, 30 }
 0x232   :  { %v1764_v59 = vadd.f32 -0.4999988, %v1763_v27  ;;  %v1771_v42 = vadd.f32 -0.16666654, %v1770_v5  ;;  %v1888_v18 = vshll.u32 %v1887_v33, 30  ;;  %v1911_v13 = vsub.s32 4, %v1887_v33 }
 0x234   :  { %v1765_v30 = vmul.f32 %v1764_v59, %v1760_v45  ;;  %v1772_v37 = vmul.f32 %v1771_v42, %v1760_v45  ;;  %v1889_v46 = vsub.s32 %v1885_v31, %v1888_v18  ;;  %v1912_v62 = vsel %vm1789_vm2, %v1911_v13, %v1887_v33 }
 0x235   :  { %v1914_v7 = vsel %vm1788_vm5, 0, %v1912_v62 }
 0x236   :  { %v1766_v25 = vadd.f32 1.0, %v1765_v30  ;;  %v1773_v0 = vadd.f32 1.0, %v1772_v37  ;;  %vm1890_vm11 = vcmp.lt.s32.totalorder %v1889_v46, 0  ;;  %v1891_v36 = vsub.s32 0, %v1889_v46 }
 0x237   :  { %v1931_v32 = vadd.s32 3, %v1914_v7 }
 0x238   :  { %v1774_v39 = vmul.f32 %v1773_v0, %v1758_v2  ;;  %v1783_v48 = vxor.u32 2147483648, %v1766_v25  ;;  %v1892_v23 = vsel %vm1890_vm11, %v1891_v36, %v1889_v46 }
 0x239   :  { %v1893_v43 = vclz %v1892_v23  ;;  %v1932_v41 = vand.u32 3, %v1931_v32 }
 0x23a   :  { %v1780_v4 = vxor.u32 2147483648, %v1774_v39  ;;  %v1784_v15 = vsel %vm1782_vm14, %v1783_v48, %v1774_v39 }
 0x23b   :  { %v2006_v17 = vadd.s32 4294967294, %v1893_v43  ;;  %vm1934_vm3 = vcmp.eq.s32.totalorder %v1932_v41, 0  ;;  %vm1937_vm4 = vcmp.eq.s32.totalorder %v1932_v41, 2  ;;  %vm1933_vm7 = vcmp.lt.s32.totalorder %v1932_v41, 2 }
 0x23c   :  { %v1781_v60 = vsel %vm1779_vm13, %v1766_v25, %v1780_v4 }
 0x23d   :  { %v1785_v11 = vsel %vm1778_vm1, %v1781_v60, %v1784_v15  ;;  %vm2007_vm0 = vcmp.lt.s32.totalorder %v2006_v17, 0 }
 0x23e   :  { %v1786_v19 = vsel %vm1775_vm15, nan, %v1785_v11  ;;  %v1896_v12 = vsel %vm2007_vm0, 0, %v2006_v17 }
 0x23f   :  { %1952 = vst [vmem:[#allocation2 + $0x50] sm:$0xff] %v1786_v19  ;;  %v1897_v24 = vsub.s32 32, %v1896_v12  ;;  %v1901_v28 = vsub.s32 4294967266, %v1896_v12  ;;  %v1898_v21 = vshll.u32 %v1889_v46, %v1896_v12 }
 0x241   :  { %v1899_v6 = vshrl.u32 %v1881_v51, %v1897_v24  ;;  %v1902_v14 = vadd.s32 127, %v1901_v28 }
 0x243   :  { %v1900_v58 = vor.u32 %v1899_v6, %v1898_v21  ;;  %v1903_v63 = vshll.u32 %v1902_v14, 23 }
 0x245   :  { %v1904_v38 = vor.u32 4788187, %v1903_v63  ;;  %v1907_v1 = vcvt.s32.f32 %v1900_v58 }
 0x247   :  { %v1905_v40 = vand.u32 2147483647, %v1904_v38 }
 0x249   :  { %v1908_v20 = vmul.f32 %v1907_v1, %v1905_v40 }
 0x24b   :  { %v1909_v29 = vxor.u32 2147483648, %v1908_v20 }
 0x24d   :  { %v1910_v52 = vsel %vm1789_vm2, %v1909_v29, %v1908_v20 }
 0x24e   :  { %v1913_v16 = vsel %vm1788_vm5, %v2119_v50, %v1910_v52 }
 0x24f   :  { %v1915_v56 = vmul.f32 %v1913_v16, %v1913_v16 }
 0x251   :  { %v1916_v2 = vmul.f32 -0.001358992, %v1915_v56  ;;  %v1923_v61 = vmul.f32 -0.00019511016, %v1915_v56 }
 0x253   :  { %v1917_v55 = vadd.f32 0.041655596, %v1916_v2  ;;  %v1924_v45 = vadd.f32 0.008332121, %v1923_v61 }
 0x255   :  { %v1918_v57 = vmul.f32 %v1917_v55, %v1915_v56  ;;  %v1925_v53 = vmul.f32 %v1924_v45, %v1915_v56 }
 0x257   :  { %v1919_v54 = vadd.f32 -0.4999988, %v1918_v57  ;;  %v1926_v35 = vadd.f32 -0.16666654, %v1925_v53 }
 0x259   :  { %v1920_v22 = vmul.f32 %v1919_v54, %v1915_v56  ;;  %v1927_v8 = vmul.f32 %v1926_v35, %v1915_v56 }
 0x25b   :  { %v1921_v34 = vadd.f32 1.0, %v1920_v22  ;;  %v1928_v10 = vadd.f32 1.0, %v1927_v8 }
 0x25d   :  { %v1929_v26 = vmul.f32 %v1928_v10, %v1913_v16  ;;  %v1938_v47 = vxor.u32 2147483648, %v1921_v34 }
 0x25f   :  { %v1935_v3 = vxor.u32 2147483648, %v1929_v26  ;;  %v1939_v5 = vsel %vm1937_vm4, %v1938_v47, %v1929_v26 }
 0x261   :  { %v1936_v27 = vsel %vm1934_vm3, %v1921_v34, %v1935_v3 }
 0x262   :  { %v1940_v31 = vsel %vm1933_vm7, %v1936_v27, %v1939_v5 }
 0x263   :  { %v1941_v59 = vsel %vm1930_vm8, nan, %v1940_v31 }
 0x264   :  { %1953 = vst [vmem:[#allocation2 + $0x58] sm:$0xf] %v1941_v59 }
 0x265   :  { %1966 = dma.vmem_to_hbm [thread:$0]  %s1959_s1, 1536, %s1961_s23, [#allocation3], %s2054_s24, %s2054_s24, %s2055_s25  }
 0x266   :  { %2044 = dma.done.wait [#allocation3], 1536  }
 0x267   :  { %2045 = vsyncadd [#allocation3], 4294965760 }
 0x268   :  { %1971 = vsyncpa [#allocation3], 1 }

</bundles_post_ra>
